<compile_context>
chip_gen: v7x
topology: tpu7x:2x2x1
jax: 0.10.0
libtpu: 0.0.40
codegen_flags: <defaults>
</compile_context>

<pallas_src>
import numpy as np
import jax
import jax.numpy as jnp
from jax import lax
from jax.experimental import pallas as pl
from jax.experimental.pallas import tpu as pltpu


# ----------------------------------------------------------------------------
# Pallas kernel: one batch tile per grid step, everything fused:
#   channel attention (avgpool -> fc1 -> relu -> fc2 -> sigmoid -> scale)
#   spatial attention (max/min over C -> conv3d-as-single-matmul -> sigmoid -> scale)
#   final CBAM output  x * (x_ca * sa)
# ----------------------------------------------------------------------------
def _cbam_kernel(x_ref, w1t_ref, w2t_ref, m_ref, b_ref, o_ref, cat_ref):
    x = x_ref[...]                                                  # (Bt, C, DHW) f32
    DHW = x.shape[-1]

    # --- channel attention (batched, lane-dense bf16 MLP, f32 accumulate) -----
    avg = jnp.mean(x, axis=-1)                                      # (Bt, C)  global avg pool
    hid = jnp.dot(avg.astype(jnp.bfloat16), w1t_ref[...],
                  preferred_element_type=jnp.float32)               # (Bt, Cr) fc1 (1x1x1 conv)
    hid = jnp.maximum(hid, 0.0)                                     # ReLU
    ca = jax.nn.sigmoid(
        jnp.dot(hid.astype(jnp.bfloat16), w2t_ref[...],
                preferred_element_type=jnp.float32))                # (Bt, C) fc2 + sigmoid
    x_ca = x * ca[:, :, None]                                       # (Bt, C, DHW)

    # --- spatial attention -----------------------------------------------------
    # max/min over channels, written into adjacent lane-aligned halves of a
    # persistent bf16 scratch (no jnp.concatenate / XLU concat), then ONE
    # K = 2*DHW bf16 MXU matmul against the dense conv matrix, f32 accumulate.
    cat_ref[:, :DHW] = jnp.max(x_ca, axis=1).astype(jnp.bfloat16)   # channel-0 rows of M
    cat_ref[:, DHW:] = jnp.min(x_ca, axis=1).astype(jnp.bfloat16)   # channel-1 rows of M
    sa = jnp.dot(cat_ref[...], m_ref[...],
                 preferred_element_type=jnp.float32) + b_ref[0]     # (Bt, DHW)
    sa = jax.nn.sigmoid(sa)

    # --- CBAM output: x * x_out, with x_out = x_ca * sa ------------------------
    o_ref[...] = (x * x_ca * sa[:, None, :]).astype(o_ref.dtype)


# ----------------------------------------------------------------------------
# Parameter setup glue: expand the (1, 2, 7, 7, 7) conv weight into a dense
# matrix mapping the channel-major flattened (2, D, H, W) input to the
# flattened (D, H, W) output (stride 1, "same" padding, zero pad implicit).
# Rows [0:DHW] correspond to input channel 0 (max pool), rows [DHW:2*DHW] to
# input channel 1 (min pool) — matching the scratch-half layout in the kernel.
# ----------------------------------------------------------------------------
def _conv3d_as_matrix(w, D, H, W):
    _, Cin, K, _, _ = w.shape
    pad = K // 2
    DHW = D * H * W
    M = np.zeros((Cin * DHW, DHW), dtype=np.float32)
    dd, hh, ww = np.meshgrid(np.arange(D), np.arange(H), np.arange(W), indexing="ij")
    out_idx = (dd * H * W + hh * W + ww).ravel()
    for c in range(Cin):
        for kd in range(K):
            for kh in range(K):
                for kw in range(K):
                    ind = dd + kd - pad
                    inh = hh + kh - pad
                    inw = ww + kw - pad
                    valid = ((ind >= 0) & (ind < D) & (inh >= 0) & (inh < H)
                             & (inw >= 0) & (inw < W)).ravel()
                    in_idx = (ind * H * W + inh * W + inw).ravel()
                    np.add.at(M, (c * DHW + in_idx[valid], out_idx[valid]),
                              float(w[0, c, kd, kh, kw]))
    return M


def cbam_pallas(x, w1, w2, conv_w, conv_b, *, batch_tile=None, out_dtype=None):
    B, C, D, H, W = x.shape
    DHW = D * H * W
    Cr = w1.shape[0]

    if batch_tile is None:
        # Overhead/HBM-bound kernel: one grid step by default (best on 1-TC
        # v5e/v6e; on v7x try batch_tile=B//2 + "parallel" only if profiling
        # shows the split beats the duplicated conv-matrix DMA per core).
        batch_tile = B
    assert B % batch_tile == 0, "batch must be divisible by batch_tile"
    n_steps = B // batch_tile
    if out_dtype is None:
        out_dtype = x.dtype

    x2 = x.reshape(B, C, DHW)

    # fc weights: pre-transposed (row-major/lane-dense matmuls) and bf16 so the
    # tiny channel-MLP avoids the non-native f32 MXU path (f32 accumulation
    # stays inside the kernel via preferred_element_type).
    w1t = jnp.asarray(w1, jnp.bfloat16).T                # (C, Cr)
    w2t = jnp.asarray(w2, jnp.bfloat16).T                # (Cr, C)

    # Dense conv-as-matrix (channel-major rows), bf16 for the MXU.
    M = _conv3d_as_matrix(np.asarray(conv_w), D, H, W)   # (2*DHW, DHW) f32
    m = jnp.asarray(M, jnp.bfloat16)                     # (2*DHW, DHW) bf16
    bias = jnp.asarray(conv_b, jnp.float32).reshape((1,))

    out = pl.pallas_call(
        _cbam_kernel,
        out_shape=jax.ShapeDtypeStruct((B, C, DHW), out_dtype),
        grid_spec=pltpu.PrefetchScalarGridSpec(
            num_scalar_prefetch=0,
            grid=(n_steps,),
            in_specs=[
                # Only x is grid-pipelined; the constants are whole-array VMEM
                # operands (single-buffered, fetched exactly once, never
                # re-DMA'd between grid steps).
                pl.BlockSpec((batch_tile, C, DHW), lambda g: (g, 0, 0)),     # x batch tile
                pl.BlockSpec(memory_space=pltpu.MemorySpace.VMEM),           # fc1 weight (T), bf16
                pl.BlockSpec(memory_space=pltpu.MemorySpace.VMEM),           # fc2 weight (T), bf16
                pl.BlockSpec(memory_space=pltpu.MemorySpace.VMEM),           # conv matrix (2*DHW, DHW)
                pl.BlockSpec(memory_space=pltpu.MemorySpace.SMEM),           # conv bias scalar
            ],
            out_specs=pl.BlockSpec((batch_tile, C, DHW), lambda g: (g, 0, 0)),
            scratch_shapes=[pltpu.VMEM((batch_tile, 2 * DHW), jnp.bfloat16)],  # max|min concat slab
        ),
        compiler_params=pltpu.CompilerParams(dimension_semantics=("parallel",)),
    )(x2, w1t, w2t, m, bias)
    return out.reshape(B, C, D, H, W)


# ----------------------------------------------------------------------------
# Pure-JAX reference (matches the PyTorch CBAM.forward semantics as written:
# avg-pool-only channel MLP, max/min spatial pooling, final x * x_out).
# ----------------------------------------------------------------------------
def cbam_reference(x, w1, w2, conv_w, conv_b):
    avg = jnp.mean(x, axis=(2, 3, 4), keepdims=True)                  # AdaptiveAvgPool3d(1)
    hid = jnp.einsum("bcdhw,rc->brdhw", avg, w1)                      # fc1 (no bias)
    hid = jnp.maximum(hid, 0.0)
    ca = jax.nn.sigmoid(jnp.einsum("brdhw,cr->bcdhw", hid, w2))       # fc2 (no bias) + sigmoid
    x_ca = x * ca
    maxp = jnp.max(x_ca, axis=1, keepdims=True)
    minp = jnp.min(x_ca, axis=1, keepdims=True)
    cat = jnp.concatenate([maxp, minp], axis=1)                       # (B, 2, D, H, W)
    sa = lax.conv_general_dilated(cat, conv_w, window_strides=(1, 1, 1),
                                  padding=[(3, 3)] * 3,
                                  dimension_numbers=("NCDHW", "OIDHW", "NCDHW"))
    sa = jax.nn.sigmoid(sa + conv_b.reshape(1, 1, 1, 1, 1))
    return x * (x_ca * sa)                                            # CBAM: x * x_out


if __name__ == "__main__":
    # Small shapes consistent with the module: channels divisible by reduction.
    B, C, reduction_ratio = 8, 16, 4
    Cr = C // reduction_ratio
    D, H, W = 4, 8, 8

    key = jax.random.PRNGKey(0)
    kx, k1, k2, k3, k4 = jax.random.split(key, 5)

    x = jax.random.normal(kx, (B, C, D, H, W), dtype=jnp.float32)
    w1 = jax.random.normal(k1, (Cr, C), dtype=jnp.float32) * 0.3            # Conv3d(C, Cr, 1) weight
    w2 = jax.random.normal(k2, (C, Cr), dtype=jnp.float32) * 0.3            # Conv3d(Cr, C, 1) weight
    conv_w = jax.random.normal(k3, (1, 2, 7, 7, 7), dtype=jnp.float32) * 0.05  # Conv3d(2, 1, 7)
    conv_b = jax.random.normal(k4, (1,), dtype=jnp.float32) * 0.1

    out = cbam_pallas(x, w1, w2, conv_w, conv_b)
    out = jax.block_until_ready(out)

    ref = jax.block_until_ready(cbam_reference(x, w1, w2, conv_w, conv_b))
    # Tolerance loosened vs. pure-f32: conv-matrix / pooled maps / channel-MLP
    # operands are bf16 (with f32 accumulation), costing a few mantissa bits.
    np.testing.assert_allclose(np.asarray(out), np.asarray(ref), rtol=2e-2, atol=2e-2)

    print("KERNEL_OK")
</pallas_src>

<mosaic_0001>
module attributes {stable_mosaic.version = 11 : i64} {
  func.func @_cbam_kernel(%arg0: i32, %arg1: memref<8x16x256xf32, #tpu.memory_space<vmem>>, %arg2: memref<16x4xbf16, #tpu.memory_space<vmem>>, %arg3: memref<4x16xbf16, #tpu.memory_space<vmem>>, %arg4: memref<512x256xbf16, #tpu.memory_space<vmem>>, %arg5: memref<1xf32, #tpu.memory_space<smem>>, %arg6: memref<8x16x256xf32, #tpu.memory_space<vmem>>, %arg7: memref<8x512xbf16, #tpu.memory_space<vmem>>) attributes {dimension_semantics = [#tpu.dimension_semantics<parallel>], iteration_bounds = array<i64: 1>, scalar_prefetch = 0 : i64, scratch_operands = 1 : i64, tpu.core_type = #tpu.core_type<tc>, window_params = [{transform_indices = @transform_0, window_bounds = array<i64: 8, 16, 256>}, {pipeline_mode = #tpu.pipeline_mode<synchronous>, transform_indices = @transform_1, window_bounds = array<i64: 16, 4>}, {pipeline_mode = #tpu.pipeline_mode<synchronous>, transform_indices = @transform_2, window_bounds = array<i64: 4, 16>}, {pipeline_mode = #tpu.pipeline_mode<synchronous>, transform_indices = @transform_3, window_bounds = array<i64: 512, 256>}, {transform_indices = @transform_4, window_bounds = array<i64: 1>}, {transform_indices = @transform_5, window_bounds = array<i64: 8, 16, 256>}]} {
    %c0 = arith.constant 0 : index
    %c0_0 = arith.constant 0 : index
    %c0_1 = arith.constant 0 : index
    %0 = vector.load %arg1[%c0, %c0_0, %c0_1] : memref<8x16x256xf32, #tpu.memory_space<vmem>>, vector<8x16x256xf32>
    %cst = arith.constant dense<0.000000e+00> : vector<8x16xf32>
    %1 = vector.multi_reduction <add>, %0, %cst [2] : vector<8x16x256xf32> to vector<8x16xf32>
    %cst_2 = arith.constant 2.560000e+02 : f32
    %2 = vector.broadcast %cst_2 : f32 to vector<8x16xf32>
    %3 = arith.divf %1, %2 : vector<8x16xf32>
    %4 = arith.truncf %3 : vector<8x16xf32> to vector<8x16xbf16>
    %c0_3 = arith.constant 0 : index
    %c0_4 = arith.constant 0 : index
    %5 = vector.load %arg2[%c0_3, %c0_4] : memref<16x4xbf16, #tpu.memory_space<vmem>>, vector<16x4xbf16>
    %cst_5 = arith.constant dense<0.000000e+00> : vector<8x4xf32>
    %6 = tpu.matmul %4, %5, %cst_5 {dimension_numbers = #tpu.dot_dimension_numbers<[1], [0], [0], [1], [0, 0, 1, 1], [], []>} : vector<8x16xbf16>, vector<16x4xbf16>, vector<8x4xf32> -> vector<8x4xf32>
    %cst_6 = arith.constant 0.000000e+00 : f32
    %7 = vector.broadcast %cst_6 : f32 to vector<8x4xf32>
    %8 = arith.maximumf %6, %7 : vector<8x4xf32>
    %9 = arith.truncf %8 : vector<8x4xf32> to vector<8x4xbf16>
    %c0_7 = arith.constant 0 : index
    %c0_8 = arith.constant 0 : index
    %10 = vector.load %arg3[%c0_7, %c0_8] : memref<4x16xbf16, #tpu.memory_space<vmem>>, vector<4x16xbf16>
    %cst_9 = arith.constant dense<0.000000e+00> : vector<8x16xf32>
    %11 = tpu.matmul %9, %10, %cst_9 {dimension_numbers = #tpu.dot_dimension_numbers<[1], [0], [0], [1], [0, 0, 1, 1], [], []>} : vector<8x4xbf16>, vector<4x16xbf16>, vector<8x16xf32> -> vector<8x16xf32>
    %12 = arith.negf %11 : vector<8x16xf32>
    %13 = math.exp %12 : vector<8x16xf32>
    %cst_10 = arith.constant 1.000000e+00 : f32
    %14 = vector.broadcast %cst_10 : f32 to vector<8x16xf32>
    %15 = arith.addf %14, %13 : vector<8x16xf32>
    %16 = arith.divf %14, %15 : vector<8x16xf32>
    %17 = vector.shape_cast %16 : vector<8x16xf32> to vector<8x16x1xf32>
    %18 = vector.broadcast %17 : vector<8x16x1xf32> to vector<8x16x256xf32>
    %19 = arith.mulf %0, %18 : vector<8x16x256xf32>
    %cst_11 = arith.constant dense<0xFF800000> : vector<8x256xf32>
    %20 = vector.multi_reduction <maximumf>, %19, %cst_11 [1] : vector<8x16x256xf32> to vector<8x256xf32>
    %21 = arith.truncf %20 : vector<8x256xf32> to vector<8x256xbf16>
    %c0_12 = arith.constant 0 : index
    %c0_13 = arith.constant 0 : index
    %22 = vector.load %arg7[%c0_12, %c0_13] : memref<8x512xbf16, #tpu.memory_space<vmem>>, vector<8x256xbf16>
    tpu.vector_store %arg7[%c0_12, %c0_13], %21 {strides = array<i32>} : memref<8x512xbf16, #tpu.memory_space<vmem>>, vector<8x256xbf16>,
    %cst_14 = arith.constant dense<0x7F800000> : vector<8x256xf32>
    %23 = vector.multi_reduction <minimumf>, %19, %cst_14 [1] : vector<8x16x256xf32> to vector<8x256xf32>
    %24 = arith.truncf %23 : vector<8x256xf32> to vector<8x256xbf16>
    %c0_15 = arith.constant 0 : index
    %c256 = arith.constant 256 : index
    %25 = vector.load %arg7[%c0_15, %c256] : memref<8x512xbf16, #tpu.memory_space<vmem>>, vector<8x256xbf16>
    tpu.vector_store %arg7[%c0_15, %c256], %24 {strides = array<i32>} : memref<8x512xbf16, #tpu.memory_space<vmem>>, vector<8x256xbf16>,
    %c0_16 = arith.constant 0 : index
    %c0_17 = arith.constant 0 : index
    %26 = vector.load %arg7[%c0_16, %c0_17] : memref<8x512xbf16, #tpu.memory_space<vmem>>, vector<8x512xbf16>
    %c0_18 = arith.constant 0 : index
    %c0_19 = arith.constant 0 : index
    %27 = vector.load %arg4[%c0_18, %c0_19] : memref<512x256xbf16, #tpu.memory_space<vmem>>, vector<512x256xbf16>
    %cst_20 = arith.constant dense<0.000000e+00> : vector<8x256xf32>
    %28 = tpu.matmul %26, %27, %cst_20 {dimension_numbers = #tpu.dot_dimension_numbers<[1], [0], [0], [1], [0, 0, 1, 1], [], []>} : vector<8x512xbf16>, vector<512x256xbf16>, vector<8x256xf32> -> vector<8x256xf32>
    %c0_21 = arith.constant 0 : index
    %29 = memref.load %arg5[%c0_21] : memref<1xf32, #tpu.memory_space<smem>>
    %30 = vector.broadcast %29 : f32 to vector<8x256xf32>
    %31 = arith.addf %28, %30 : vector<8x256xf32>
    %32 = arith.negf %31 : vector<8x256xf32>
    %33 = math.exp %32 : vector<8x256xf32>
    %cst_22 = arith.constant 1.000000e+00 : f32
    %34 = vector.broadcast %cst_22 : f32 to vector<8x256xf32>
    %35 = arith.addf %34, %33 : vector<8x256xf32>
    %36 = arith.divf %34, %35 : vector<8x256xf32>
    %37 = arith.mulf %0, %19 : vector<8x16x256xf32>
    %38 = vector.shape_cast %36 : vector<8x256xf32> to vector<8x1x256xf32>
    %39 = vector.broadcast %38 : vector<8x1x256xf32> to vector<8x16x256xf32>
    %40 = arith.mulf %37, %39 : vector<8x16x256xf32>
    %c0_23 = arith.constant 0 : index
    %c0_24 = arith.constant 0 : index
    %c0_25 = arith.constant 0 : index
    %41 = vector.load %arg6[%c0_23, %c0_24, %c0_25] : memref<8x16x256xf32, #tpu.memory_space<vmem>>, vector<8x16x256xf32>
    tpu.vector_store %arg6[%c0_23, %c0_24, %c0_25], %40 {strides = array<i32>} : memref<8x16x256xf32, #tpu.memory_space<vmem>>, vector<8x16x256xf32>,
    return
  }
  func.func @transform_0(%arg0: i32) -> (i32, i32, i32) {
    %c0_i32 = arith.constant 0 : i32
    %c0_i32_0 = arith.constant 0 : i32
    %c0_i32_1 = arith.constant 0 : i32
    return %arg0, %c0_i32, %c0_i32_0 : i32, i32, i32
  }
  func.func @transform_1(%arg0: i32) -> (i32, i32) {
    %c0_i32 = arith.constant 0 : i32
    %c0_i32_0 = arith.constant 0 : i32
    %c0_i32_1 = arith.constant 0 : i32
    return %c0_i32, %c0_i32_0 : i32, i32
  }
  func.func @transform_2(%arg0: i32) -> (i32, i32) {
    %c0_i32 = arith.constant 0 : i32
    %c0_i32_0 = arith.constant 0 : i32
    %c0_i32_1 = arith.constant 0 : i32
    return %c0_i32, %c0_i32_0 : i32, i32
  }
  func.func @transform_3(%arg0: i32) -> (i32, i32) {
    %c0_i32 = arith.constant 0 : i32
    %c0_i32_0 = arith.constant 0 : i32
    %c0_i32_1 = arith.constant 0 : i32
    return %c0_i32, %c0_i32_0 : i32, i32
  }
  func.func @transform_4(%arg0: i32) -> i32 {
    %c0_i32 = arith.constant 0 : i32
    %c0_i32_0 = arith.constant 0 : i32
    return %c0_i32 : i32
  }
  func.func @transform_5(%arg0: i32) -> (i32, i32, i32) {
    %c0_i32 = arith.constant 0 : i32
    %c0_i32_0 = arith.constant 0 : i32
    %c0_i32_1 = arith.constant 0 : i32
    return %arg0, %c0_i32, %c0_i32_0 : i32, i32, i32
  }
}

</mosaic_0001>

<bundles_post_ra>
// kernel: tpu_custom_call.1
= control target key start
LH: loop header
LB: loop body
LE: loop exit
PB: predicated region body
PF: predicated region fallthrough
CT: control target
= control target key end

     0   :  { %11 = vsyncpa [#allocation5], 0  ;;  %s2652_s0 = inlined_call_operand.hbm [shape: f32[8,16,256], index: 0, kind: input, shape index: {}]   ;;  %s2653_s1 = inlined_call_operand.vmem [shape: bf16[16,4], index: 1, kind: input, shape index: {}]   ;;  %s2654_s2 = inlined_call_operand.vmem [shape: bf16[4,16], index: 2, kind: input, shape index: {}]   ;;  %s2655_s3 = inlined_call_operand.hbm [shape: bf16[512,256], index: 3, kind: input, shape index: {}]   ;;  %s2656_s4 = inlined_call_operand.<no memory space> [shape: f32[1], index: 4, kind: input, shape index: {}]   ;;  %s2657_s5 = inlined_call_operand.hbm [shape: f32[8,16,256], index: 5, kind: output, shape index: {}]  }
   0x1   :  { %12 = vsyncpa [#allocation8], 0 }
   0x2   :  { %13 = vsyncpa [#allocation6], 0  ;;  %s1997_s18 = smov [#allocation4]   ;;  %s1925_s22 = scalar_lea.hbm %s2652_s0, 4096 }
   0x3   :  { %s19_s19 = sshll.u32 %s1997_s18, 4  ;;  %p1926_p0 = scmp.ne.s32.totalorder %s2652_s0, %s1925_s22  ;;  %s20_s19 = int_to_ptr.vmem [resolvable:$true] %s19_s19 }
   0x4   :  { %p1929_p1 = scmp.lt.u32.totalorder %s1925_s22, %s2652_s0 }
   0x6   :  { %p1931_p2 = pnand %p1929_p1, %p1926_p0 }
   0x8   :  { %1934 = shalt.err (!%p1931_p2)
}
   0x9   :  { %s1935_s27 = scalar_lea.vmem %s20_s19, 4096  ;;  %p1940_p4 = scmp.lt.s32.totalorder %s20_s19, %s20_s19 }
   0xa   :  { %p1936_p3 = scmp.ne.s32.totalorder %s20_s19, %s1935_s27  ;;  %p1941_p5 = scmp.lt.s32.totalorder %s1935_s27, %s1935_s27 }
   0xc   :  { %p1942_p6 = por %p1941_p5, %p1940_p4 }
   0xe   :  { %p1943_p7 = pnand %p1942_p6, %p1936_p3 }
  0x10   :  { %1946 = shalt.err (!%p1943_p7)
}
  0x11   :  { %s1998_s28 = smov 256   ;;  %s1999_s29 = smov 16  }
  0x12   :  { %25 = dma.hbm_to_vmem [thread:$0]  %s2652_s0, 4096, %s20_s19, [#allocation5], %s1998_s28, %s1998_s28, %s1999_s29  }
  0x13   :  { %s2000_s7 = smov [#allocation7]   ;;  %s1947_s11 = scalar_lea.hbm %s2655_s3, 8192 }
  0x14   :  { %s35_s8 = sshll.u32 %s2000_s7, 4  ;;  %p1948_p8 = scmp.ne.s32.totalorder %s2655_s3, %s1947_s11  ;;  %s36_s8 = int_to_ptr.vmem [resolvable:$true] %s35_s8 }
  0x15   :  { %p1951_p9 = scmp.lt.u32.totalorder %s1947_s11, %s2655_s3 }
  0x17   :  { %p1953_p10 = pnand %p1951_p9, %p1948_p8 }
  0x19   :  { %1956 = shalt.err (!%p1953_p10)
}
  0x1a   :  { %s1957_s16 = scalar_lea.vmem %s36_s8, 8192  ;;  %p1962_p12 = scmp.lt.s32.totalorder %s36_s8, %s36_s8 }
  0x1b   :  { %p1958_p11 = scmp.ne.s32.totalorder %s36_s8, %s1957_s16  ;;  %p1963_p13 = scmp.lt.s32.totalorder %s1957_s16, %s1957_s16 }
  0x1d   :  { %p1964_p0 = por %p1963_p13, %p1962_p12 }
  0x1f   :  { %p1965_p1 = pnand %p1964_p0, %p1958_p11 }
  0x21   :  { %1968 = shalt.err (!%p1965_p1)
}
  0x22   :  { %s2001_s0 = smov 128   ;;  %s2002_s17 = smov 8  }
  0x23   :  { %41 = dma.hbm_to_vmem [thread:$0]  %s2655_s3, 8192, %s36_s8, [#allocation8], %s2001_s0, %s2001_s0, %s2002_s17  }
  0x24   :  { %1991 = dma.done.wait [#allocation5], 4096  }
  0x25   :  { %1992 = vsyncadd [#allocation5], 4294963200 }
  0x26   :  { %1993 = dma.done.wait [#allocation8], 8192  }
  0x27   :  { %1994 = vsyncadd [#allocation8], 4294959104  ;;  %v2064_v0 = vld [vmem:[#allocation4 + $0x20] sm:$0xff]  ;;  %v2066_v1 = vld [vmem:[#allocation4 + $0x28] sm:$0xff]  ;;  %v2003_v49 = vmov 0.0   ;;  %vm2004_vm0 = vmmov 0   ;;  %v182_v54 = vlaneseq }
  0x28   :  { %v2068_v2 = vld [vmem:[#allocation4] sm:$0xff]  ;;  %v89_v3 = vadd.f32 %v2066_v1, %v2064_v0  ;;  %v2072_v4 = vld [vmem:[#allocation4 + $0x8] sm:$0xff]  ;;  %v2074_v5 = vld [vmem:[#allocation4 + $0x30] sm:$0xff]  ;;  %1758 = vmatprep.subr.bf16.mxu0 %v2003_v49  ;;  %1760 = vmatprep.mubr.msk.bf16.mxu0 %vm2004_vm0, %v2003_v49  ;;  %vm193_vm1 = vcmask 130112   ;;  %vm258_vm2 = vcmask 1041409   ;;  %vm260_vm3 = vcmask 1042434  }
  0x29   :  { %v2076_v6 = vld [vmem:[#allocation4 + $0x38] sm:$0xff]  ;;  %v83_v7 = vadd.f32 %v2072_v4, %v2068_v2  ;;  %v2080_v8 = vld [vmem:[#allocation4 + $0x10] sm:$0xff]  ;;  %v2092_v14 = vld [vmem:[#allocation4 + $0x40] sm:$0xff]  ;;  %1764 = vmatprep.subr.bf16.mxu1 %v2003_v49  ;;  %1766 = vmatprep.mubr.msk.bf16.mxu1 %vm2004_vm0, %v2003_v49  ;;  %v183_v58 = vand.u32 127, %v182_v54  ;;  %vm262_vm4 = vcmask 1043459   ;;  %vm264_vm5 = vcmask 1044484  }
  0x2a   :  { %v2082_v9 = vld [vmem:[#allocation4 + $0x18] sm:$0xff]  ;;  %90 = vadd.xlane.f32.xlu1 %v89_v3  ;;  %v92_v10 = vadd.f32 %v2076_v6, %v2074_v5  ;;  %v2088_v12 = vld [vmem:[#allocation4 + $0x50] sm:$0xff]  ;;  %v2094_v15 = vld [vmem:[#allocation4 + $0x48] sm:$0xff]  ;;  %v2115_v3 = vshrl.u32 %v182_v54, 7  ;;  %vm266_vm6 = vcmask 1045509   ;;  %vm268_vm7 = vcmask 1046534  }
  0x2b   :  { %84 = vadd.xlane.f32.xlu0 %v83_v7  ;;  %v86_v11 = vadd.f32 %v2082_v9, %v2080_v8  ;;  %v2090_v13 = vld [vmem:[#allocation4 + $0x58] sm:$0xff]  ;;  %v95_v17 = vadd.f32 %v2094_v15, %v2092_v14  ;;  %v2100_v18 = vld [vmem:[#allocation4 + $0x70] sm:$0xff]  ;;  %v2104_v20 = vld [vmem:[#allocation4 + $0x60] sm:$0xff]  ;;  %vm270_vm8 = vcmask 1047559   ;;  %vm279_vm9 = vcmask 130048  }
  0x2c   :  { %v98_v16 = vadd.f32 %v2090_v13, %v2088_v12  ;;  %v2102_v19 = vld [vmem:[#allocation4 + $0x78] sm:$0xff]  ;;  %v2106_v21 = vld [vmem:[#allocation4 + $0x68] sm:$0xff]  ;;  %v69_v22 = vld [vmem:[#allocation4 + $0x90] sm:$0xff]  ;;  %vm330_vm10 = vcmask 1041408   ;;  %vm326_vm11 = vcmask 31744  }
  0x2d   :  { %v70_v23 = vld [vmem:[#allocation4 + $0x98] sm:$0xff]  ;;  %v104_v24 = vadd.f32 %v2102_v19, %v2100_v18  ;;  %v67_v25 = vld [vmem:[#allocation4 + $0x80] sm:$0xff]  ;;  %v68_v26 = vld [vmem:[#allocation4 + $0x88] sm:$0xff]  ;;  %v101_v27 = vadd.f32 %v2106_v21, %v2104_v20 }
  0x2e   :  { %93 = vadd.xlane.f32.xlu1 %v92_v10  ;;  %v73_v28 = vld [vmem:[#allocation4 + $0xb0] sm:$0xff]  ;;  %v74_v29 = vld [vmem:[#allocation4 + $0xb8] sm:$0xff]  ;;  %v110_v30 = vadd.f32 %v70_v23, %v69_v22  ;;  %v71_v31 = vld [vmem:[#allocation4 + $0xa0] sm:$0xff]  ;;  %v107_v33 = vadd.f32 %v68_v26, %v67_v25  ;;  %v188_v10 = vadd.s32 4294967288, %v183_v58 }
  0x2f   :  { %87 = vadd.xlane.f32.xlu0 %v86_v11  ;;  %v72_v32 = vld [vmem:[#allocation4 + $0xa8] sm:$0xff]  ;;  %v77_v34 = vld [vmem:[#allocation4 + $0xd0] sm:$0xff]  ;;  %v78_v35 = vld [vmem:[#allocation4 + $0xd8] sm:$0xff]  ;;  %v116_v36 = vadd.f32 %v74_v29, %v73_v28 }
  0x30   :  { %v75_v37 = vld [vmem:[#allocation4 + $0xc0] sm:$0xff]  ;;  %v76_v38 = vld [vmem:[#allocation4 + $0xc8] sm:$0xff]  ;;  %v113_v39 = vadd.f32 %v72_v32, %v71_v31  ;;  %v81_v40 = vld [vmem:[#allocation4 + $0xf0] sm:$0xff]  ;;  %v122_v42 = vadd.f32 %v78_v35, %v77_v34 }
  0x31   :  { %v82_v41 = vld [vmem:[#allocation4 + $0xf8] sm:$0xff]  ;;  %v79_v43 = vld [vmem:[#allocation4 + $0xe0] sm:$0xff]  ;;  %v80_v44 = vld [vmem:[#allocation4 + $0xe8] sm:$0xff]  ;;  %v119_v45 = vadd.f32 %v76_v38, %v75_v37 }
  0x32   :  { %99 = vadd.xlane.f32.xlu1 %v98_v16  ;;  %v128_v46 = vadd.f32 %v82_v41, %v81_v40  ;;  %v125_v47 = vadd.f32 %v80_v44, %v79_v43  ;;  %v1784_v48 = vld [vmem:[%s2653_s1] sm:$0xff]  }
  0x33   :  { %96 = vadd.xlane.f32.xlu0 %v95_v17  ;;  %1759 = vmatpush3.bf16.msra.mxu0 %v1784_v48 }
  0x36   :  { %105 = vadd.xlane.f32.xlu1 %v104_v24 }
  0x37   :  { %102 = vadd.xlane.f32.xlu0 %v101_v27  ;;  %v2118_v27 = vsub.s32 %v183_v58, %v2115_v3 }
  0x3a   :  { %111 = vadd.xlane.f32.xlu1 %v110_v30  ;;  %v2121_v30 = vsub.s32 %v188_v10, %v2115_v3 }
  0x3b   :  { %108 = vadd.xlane.f32.xlu0 %v107_v33 }
  0x3e   :  { %117 = vadd.xlane.f32.xlu1 %v116_v36 }
  0x3f   :  { %114 = vadd.xlane.f32.xlu0 %v113_v39 }
  0x42   :  { %123 = vadd.xlane.f32.xlu1 %v122_v42 }
  0x43   :  { %120 = vadd.xlane.f32.xlu0 %v119_v45 }
  0x46   :  { %129 = vadd.xlane.f32.xlu1 %v128_v46 }
  0x47   :  { %126 = vadd.xlane.f32.xlu0 %v125_v47 }
  0xb7   :  { %v91_v50 = vpop.xlane.xlu1 %90 }
  0xb8   :  { %v85_v51 = vpop.xlane.xlu0 %84  ;;  %v134_v60 = vmul.f32 0.00390625, %v91_v50 }
  0xb9   :  { %v132_v62 = vmul.f32 0.00390625, %v85_v51 }
  0xbb   :  { %v94_v52 = vpop.xlane.xlu1 %93 }
  0xbc   :  { %v88_v53 = vpop.xlane.xlu0 %87  ;;  %v135_v57 = vmul.f32 0.00390625, %v94_v52 }
  0xbd   :  { %v133_v59 = vmul.f32 0.00390625, %v88_v53 }
  0xbe   :  { %v149_v7 = vpack.c.bf16 %v135_v57, %v134_v60 }
  0xbf   :  { %v100_v55 = vpop.xlane.xlu1 %99  ;;  %v148_v11 = vpack.c.bf16 %v133_v59, %v132_v62 }
  0xc0   :  { %v97_v56 = vpop.xlane.xlu0 %96  ;;  %v137_v16 = vmul.f32 0.00390625, %v100_v55  ;;  %v168_v28 = vunpack.c.l.b16 %v149_v7  ;;  %v169_v31 = vunpack.c.h.b16 %v149_v7 }
  0xc1   :  { %v136_v17 = vmul.f32 0.00390625, %v97_v56  ;;  %v166_v32 = vunpack.c.l.b16 %v148_v11  ;;  %v167_v34 = vunpack.c.h.b16 %v148_v11 }
  0xc2   :  { %v198_v40 = vrot.slane %v168_v28, %v2118_v27  ;;  %v202_v42 = vrot.slane %v169_v31, %v2121_v30 }
  0xc3   :  { %v106_v61 = vpop.xlane.xlu1 %105  ;;  %v150_v33 = vpack.c.bf16 %v137_v16, %v136_v17  ;;  %v187_v43 = vrot.slane %v166_v32, %v2118_v27  ;;  %v192_v46 = vrot.slane %v167_v34, %v2121_v30 }
  0xc4   :  { %v103_v63 = vpop.xlane.xlu0 %102  ;;  %v139_v22 = vmul.f32 0.00390625, %v106_v61  ;;  %v203_v58 = vsel %vm193_vm1, %v202_v42, %v198_v40 }
  0xc5   :  { %v138_v23 = vmul.f32 0.00390625, %v103_v63  ;;  %v170_v44 = vunpack.c.l.b16 %v150_v33  ;;  %v171_v45 = vunpack.c.h.b16 %v150_v33  ;;  %v194_v61 = vsel %vm193_vm1, %v192_v46, %v187_v43 }
  0xc7   :  { %v112_v24 = vpop.xlane.xlu1 %111  ;;  %v151_v35 = vpack.c.bf16 %v139_v22, %v138_v23  ;;  %v207_v59 = vrot.slane %v170_v44, %v2118_v27  ;;  %v211_v60 = vrot.slane %v171_v45, %v2121_v30 }
  0xc8   :  { %v141_v25 = vmul.f32 0.00390625, %v112_v24  ;;  %v109_v26 = vpop.xlane.xlu0 %108 }
  0xc9   :  { %v140_v29 = vmul.f32 0.00390625, %v109_v26  ;;  %v172_v47 = vunpack.c.l.b16 %v151_v35  ;;  %v173_v48 = vunpack.c.h.b16 %v151_v35  ;;  %v259_v35 = vsel %vm258_vm2, %v203_v58, %v194_v61  ;;  %v1787_v58 = vld [vmem:[#allocation7 + $0x4] ss:$8 sps:$4 sm:$0xff]   ;;  %v1793_v61 = vld [vmem:[#allocation7 + $0x14] ss:$8 sps:$4 sm:$0xff]  }
  0xcb   :  { %v118_v36 = vpop.xlane.xlu1 %117  ;;  %v152_v37 = vpack.c.bf16 %v141_v25, %v140_v29  ;;  %v216_v62 = vrot.slane %v172_v47, %v2118_v27  ;;  %v220_v63 = vrot.slane %v173_v48, %v2121_v30  ;;  %v212_v29 = vsel %vm193_vm1, %v211_v60, %v207_v59  ;;  %v1788_v59 = vld [vmem:[#allocation7 + $0x100] ss:$8 sps:$4 sm:$0xff]   ;;  %v1790_v60 = vld [vmem:[#allocation7 + $0x104] ss:$8 sps:$4 sm:$0xff]  }
  0xcc   :  { %v143_v38 = vmul.f32 0.00390625, %v118_v36  ;;  %v115_v39 = vpop.xlane.xlu0 %114  ;;  %1345 = vmatprep.subr.bf16.mxu0 %v1790_v60  ;;  %v1821_v60 = vld [vmem:[#allocation7 + $0x60] ss:$8 sps:$4 sm:$0xff]  }
  0xcd   :  { %v142_v41 = vmul.f32 0.00390625, %v115_v39  ;;  %v174_v51 = vunpack.c.l.b16 %v152_v37  ;;  %v175_v52 = vunpack.c.h.b16 %v152_v37  ;;  %v221_v31 = vsel %vm193_vm1, %v220_v63, %v216_v62  ;;  %v1796_v62 = vld [vmem:[#allocation7 + $0x114] ss:$8 sps:$4 sm:$0xff]   ;;  %v1791_v63 = vld [vmem:[#allocation7 + $0x10] ss:$8 sps:$4 sm:$0xff]  }
  0xce   :  { %v261_v37 = vsel %vm260_vm3, %v212_v29, %v259_v35  ;;  %v1800_v29 = vld [vmem:[#allocation7 + $0x120] ss:$8 sps:$4 sm:$0xff]   ;;  %v2158_v35 = vsub.s32 0, %v2115_v3 }
  0xcf   :  { %v153_v49 = vpack.c.bf16 %v143_v38, %v142_v41  ;;  %v124_v50 = vpop.xlane.xlu1 %123  ;;  %v225_v11 = vrot.slane %v174_v51, %v2118_v27  ;;  %v229_v16 = vrot.slane %v175_v52, %v2121_v30  ;;  %v263_v41 = vsel %vm262_vm4, %v221_v31, %v261_v37  ;;  %v325_v51 = vld [vmem:[%s2654_s2] sm:$0x3]  ;;  %v1805_v31 = vld [vmem:[#allocation7 + $0x34] ss:$8 sps:$4 sm:$0xff]  }
  0xd0   :  { %v145_v53 = vmul.f32 0.00390625, %v124_v50  ;;  %v121_v54 = vpop.xlane.xlu0 %120  ;;  %2694 = vst [vmem:[#allocation13_spill] sm:$0xff] %v2158_v35 }
  0xd1   :  { %v176_v55 = vunpack.c.l.b16 %v153_v49  ;;  %v177_v56 = vunpack.c.h.b16 %v153_v49  ;;  %v144_v57 = vmul.f32 0.00390625, %v121_v54  ;;  %v230_v36 = vsel %vm193_vm1, %v229_v16, %v225_v11 }
  0xd2   :  { %v265_v43 = vsel %vm264_vm5, %v230_v36, %v263_v41 }
  0xd3   :  { %v154_v7 = vpack.c.bf16 %v145_v53, %v144_v57  ;;  %v130_v10 = vpop.xlane.xlu1 %129  ;;  %v234_v17 = vrot.slane %v176_v55, %v2118_v27  ;;  %v238_v24 = vrot.slane %v177_v56, %v2121_v30  ;;  %v1785_v57 = vld [vmem:[#allocation7] ss:$8 sps:$4 sm:$0xff]  }
  0xd4   :  { %v147_v22 = vmul.f32 0.00390625, %v130_v10  ;;  %v127_v23 = vpop.xlane.xlu0 %126 }
  0xd5   :  { %v178_v25 = vunpack.c.l.b16 %v154_v7  ;;  %v179_v26 = vunpack.c.h.b16 %v154_v7  ;;  %v146_v28 = vmul.f32 0.00390625, %v127_v23  ;;  %v239_v38 = vsel %vm193_vm1, %v238_v24, %v234_v17  ;;  %v1794_v7 = vld [vmem:[#allocation7 + $0x110] ss:$8 sps:$4 sm:$0xff]  }
  0xd6   :  { %v267_v46 = vsel %vm266_vm6, %v239_v38, %v265_v43  ;;  %v2162_v38 = vsub.s32 1, %v2115_v3  ;;  %v1811_v43 = vld [vmem:[#allocation7 + $0x44] ss:$8 sps:$4 sm:$0xff]  }
  0xd7   :  { %v243_v32 = vrot.slane %v178_v25, %v2118_v27  ;;  %v247_v33 = vrot.slane %v179_v26, %v2121_v30  ;;  %v155_v34 = vpack.c.bf16 %v147_v22, %v146_v28  ;;  %v1799_v25 = vld [vmem:[#allocation7 + $0x24] ss:$8 sps:$4 sm:$0xff]   ;;  %v1797_v28 = vld [vmem:[#allocation7 + $0x20] ss:$8 sps:$4 sm:$0xff]  }
  0xd8   :  { %v1802_v26 = vld [vmem:[#allocation7 + $0x124] ss:$8 sps:$4 sm:$0xff]   ;;  %2695 = vst [vmem:[#allocation14_spill] sm:$0xff] %v2162_v38 }
  0xd9   :  { %v180_v39 = vunpack.c.l.b16 %v155_v34  ;;  %v181_v40 = vunpack.c.h.b16 %v155_v34  ;;  %v248_v42 = vsel %vm193_vm1, %v247_v33, %v243_v32  ;;  %v1808_v32 = vld [vmem:[#allocation7 + $0x134] ss:$8 sps:$4 sm:$0xff]   ;;  %v1803_v33 = vld [vmem:[#allocation7 + $0x30] ss:$8 sps:$4 sm:$0xff]  }
  0xda   :  { %v269_v48 = vsel %vm268_vm7, %v248_v42, %v267_v46  ;;  %v1806_v34 = vld [vmem:[#allocation7 + $0x130] ss:$8 sps:$4 sm:$0xff]   ;;  %v415_v42 = vsub.s32 3, %v2115_v3  ;;  %v1812_v46 = vld [vmem:[#allocation7 + $0x140] ss:$8 sps:$4 sm:$0xff]  }
  0xdb   :  { %v252_v44 = vrot.slane %v180_v39, %v2118_v27  ;;  %v256_v45 = vrot.slane %v181_v40, %v2121_v30  ;;  %v332_v27 = vsel %vm330_vm10, %v325_v51, 0  ;;  %v404_v39 = vsub.s32 2, %v2115_v3  ;;  %v1817_v51 = vld [vmem:[#allocation7 + $0x54] ss:$8 sps:$4 sm:$0xff]  }
  0xdc   :  { %1765 = vmatpush3.bf16.msra.mxu1 %v332_v27  ;;  %v1820_v27 = vld [vmem:[#allocation7 + $0x154] ss:$8 sps:$4 sm:$0xff]  }
  0xdd   :  { %v257_v47 = vsel %vm193_vm1, %v256_v45, %v252_v44  ;;  %1304 = vmatprep.subr.bf16.mxu1 %v1787_v58  ;;  %v1814_v44 = vld [vmem:[#allocation7 + $0x144] ss:$8 sps:$4 sm:$0xff]   ;;  %v1809_v45 = vld [vmem:[#allocation7 + $0x40] ss:$8 sps:$4 sm:$0xff]  }
  0xde   :  { %v271_v49 = vsel %vm270_vm8, %v257_v47, %v269_v48  ;;  %v426_v48 = vsub.s32 4, %v2115_v3  ;;  %v1823_v58 = vld [vmem:[#allocation7 + $0x64] ss:$8 sps:$4 sm:$0xff]  }
  0xdf   :  { %v272_v50 = vpack.c.b16 %v271_v49, %v271_v49 }
  0xe1   :  { %1761 = vmatmul.mubr.msk.bf16.vlgmr.msra.gmra.mrb[0].mxu0 %vm279_vm9, %v272_v50  ;;  %v437_v50 = vsub.s32 5, %v2115_v3 }
  0xe2   :  { %1346 = vmatpush1.bf16.msra.mxu0 %v1788_v59  ;;  %v1826_v59 = vld [vmem:[#allocation7 + $0x164] ss:$8 sps:$4 sm:$0xff]  }
  0xe3   :  { %1347 = vmatprep.subr.bf16.mxu0 %v1796_v62  ;;  %v1829_v62 = vld [vmem:[#allocation7 + $0x74] ss:$8 sps:$4 sm:$0xff]  }
  0xe6   :  { %1348 = vmatpush1.bf16.msra.mxu0 %v1794_v7  ;;  %v1827_v7 = vld [vmem:[#allocation7 + $0x70] ss:$8 sps:$4 sm:$0xff]  }
  0xe7   :  { %1349 = vmatprep.subr.bf16.mxu0 %v1802_v26  ;;  %v1842_v26 = vld [vmem:[#allocation7 + $0x190] ss:$8 sps:$4 sm:$0xff]  }
  0xea   :  { %1350 = vmatpush1.bf16.msra.mxu0 %v1800_v29  ;;  %v1850_v29 = vld [vmem:[#allocation7 + $0x1a4] ss:$8 sps:$4 sm:$0xff]  }
  0xeb   :  { %1351 = vmatprep.subr.bf16.mxu0 %v1808_v32  ;;  %v1848_v32 = vld [vmem:[#allocation7 + $0x1a0] ss:$8 sps:$4 sm:$0xff]  }
  0xee   :  { %1352 = vmatpush1.bf16.msra.mxu0 %v1806_v34  ;;  %v1856_v34 = vld [vmem:[#allocation7 + $0x1b4] ss:$8 sps:$4 sm:$0xff]  }
  0xef   :  { %1353 = vmatprep.subr.bf16.mxu0 %v1814_v44  ;;  %v1863_v44 = vld [vmem:[#allocation7 + $0xd0] ss:$8 sps:$4 sm:$0xff]  }
  0xf2   :  { %1354 = vmatpush1.bf16.msra.mxu0 %v1812_v46  ;;  %v1868_v46 = vld [vmem:[#allocation7 + $0x1d4] ss:$8 sps:$4 sm:$0xff]  }
  0xf3   :  { %1355 = vmatprep.subr.bf16.mxu0 %v1820_v27  ;;  %v1880_v27 = vld [vmem:[#allocation7 + $0x1f4] ss:$8 sps:$4 sm:$0xff]  }
 0x1b4   :  { %v317_v30 = vpop.f32.mrb[0].mxu0 }
 0x1b5   :  { %v323_v52 = vmax.f32 %v317_v30, 0.0  ;;  %v1762_v53 = vpop.f32.mrb[1].mxu0  ;;  %v1815_v30 = vld [vmem:[#allocation7 + $0x50] ss:$8 sps:$4 sm:$0xff]  }
 0x1b6   :  { %v320_v54 = vpop.f32.mrb[2].mxu0 }
 0x1b7   :  { %v324_v55 = vpack.c.bf16 %v323_v52, %v323_v52  ;;  %v1763_v56 = vpop.f32.mrb[3].mxu0  ;;  %v1818_v52 = vld [vmem:[#allocation7 + $0x150] ss:$8 sps:$4 sm:$0xff]   ;;  %v448_v54 = vsub.s32 6, %v2115_v3 }
 0x1b8   :  { %1356 = vmatpush1.bf16.msra.mxu0 %v1818_v52  ;;  %v459_v56 = vsub.s32 7, %v2115_v3  ;;  %v1878_v52 = vld [vmem:[#allocation7 + $0x1f0] ss:$8 sps:$4 sm:$0xff]  }
 0x1b9   :  { %1767 = vmatmul.mubr.msk.bf16.vlgmr.msra.gmra.mrb[0].mxu1 %vm326_vm11, %v324_v55  ;;  %1357 = vmatprep.subr.bf16.mxu0 %v1826_v59 }
 0x1ba   :  { %1305 = vmatpush1.bf16.msra.mxu1 %v1785_v57 }
 0x1bb   :  { %1306 = vmatprep.subr.bf16.mxu1 %v1793_v61  ;;  %v1824_v61 = vld [vmem:[#allocation7 + $0x160] ss:$8 sps:$4 sm:$0xff]  }
 0x1bc   :  { %1358 = vmatpush1.bf16.msra.mxu0 %v1824_v61 }
 0x1be   :  { %1307 = vmatpush1.bf16.msra.mxu1 %v1791_v63  ;;  %v1832_v63 = vld [vmem:[#allocation7 + $0x174] ss:$8 sps:$4 sm:$0xff]  }
 0x1bf   :  { %1308 = vmatprep.subr.bf16.mxu1 %v1799_v25  ;;  %1359 = vmatprep.subr.bf16.mxu0 %v1832_v63  ;;  %v1839_v25 = vld [vmem:[#allocation7 + $0x90] ss:$8 sps:$4 sm:$0xff]  }
 0x1c2   :  { %1309 = vmatpush1.bf16.msra.mxu1 %v1797_v28  ;;  %v1847_v28 = vld [vmem:[#allocation7 + $0xa4] ss:$8 sps:$4 sm:$0xff]  }
 0x1c3   :  { %1310 = vmatprep.subr.bf16.mxu1 %v1805_v31  ;;  %v1845_v31 = vld [vmem:[#allocation7 + $0xa0] ss:$8 sps:$4 sm:$0xff]  }
 0x1c6   :  { %1311 = vmatpush1.bf16.msra.mxu1 %v1803_v33  ;;  %v1853_v33 = vld [vmem:[#allocation7 + $0xb4] ss:$8 sps:$4 sm:$0xff]  }
 0x1c7   :  { %1312 = vmatprep.subr.bf16.mxu1 %v1811_v43  ;;  %v1865_v43 = vld [vmem:[#allocation7 + $0xd4] ss:$8 sps:$4 sm:$0xff]  }
 0x1ca   :  { %1313 = vmatpush1.bf16.msra.mxu1 %v1809_v45  ;;  %v1866_v45 = vld [vmem:[#allocation7 + $0x1d0] ss:$8 sps:$4 sm:$0xff]  }
 0x1cb   :  { %1314 = vmatprep.subr.bf16.mxu1 %v1817_v51  ;;  %v1877_v51 = vld [vmem:[#allocation7 + $0xf4] ss:$8 sps:$4 sm:$0xff]  }
 0x1ce   :  { %1315 = vmatpush1.bf16.msra.mxu1 %v1815_v30  ;;  %v1875_v30 = vld [vmem:[#allocation7 + $0xf0] ss:$8 sps:$4 sm:$0xff]  }
 0x1cf   :  { %1316 = vmatprep.subr.bf16.mxu1 %v1823_v58 }
 0x1d2   :  { %1317 = vmatpush1.bf16.msra.mxu1 %v1821_v60 }
 0x1d3   :  { %1318 = vmatprep.subr.bf16.mxu1 %v1829_v62 }
 0x1d6   :  { %1319 = vmatpush1.bf16.msra.mxu1 %v1827_v7 }
 0x28c   :  { %v368_v10 = vpop.f32.mrb[0].mxu1 }
 0x28d   :  { %v1647_v11 = vmul.f32 -1.442695, %v368_v10  ;;  %v1768_v16 = vpop.f32.mrb[1].mxu1  ;;  %v1830_v10 = vld [vmem:[#allocation7 + $0x170] ss:$8 sps:$4 sm:$0xff]  }
 0x28e   :  { %v371_v17 = vpop.f32.mrb[2].mxu1  ;;  %1360 = vmatpush1.bf16.msra.mxu0 %v1830_v10  ;;  %v1838_v16 = vld [vmem:[#allocation7 + $0x184] ss:$8 sps:$4 sm:$0xff]  }
 0x28f   :  { %1881 = vpow2.f32 %v1647_v11  ;;  %v1769_v22 = vpop.f32.mrb[3].mxu1  ;;  %v1835_v11 = vld [vmem:[#allocation7 + $0x84] ss:$8 sps:$4 sm:$0xff]   ;;  %v1833_v17 = vld [vmem:[#allocation7 + $0x80] ss:$8 sps:$4 sm:$0xff]   ;;  %1361 = vmatprep.subr.bf16.mxu0 %v1838_v16 }
 0x290   :  { %v1836_v22 = vld [vmem:[#allocation7 + $0x180] ss:$8 sps:$4 sm:$0xff]   ;;  %1320 = vmatprep.subr.bf16.mxu1 %v1835_v11 }
 0x291   :  { %1321 = vmatpush1.bf16.msra.mxu1 %v1833_v17 }
 0x292   :  { %1362 = vmatpush1.bf16.msra.mxu0 %v1836_v22 }
 0x299   :  { %v1882_v23 = vpop.eup %1881 }
 0x29a   :  { %v377_v24 = vadd.f32 1.0, %v1882_v23  ;;  %v1841_v23 = vld [vmem:[#allocation7 + $0x94] ss:$8 sps:$4 sm:$0xff]  }
 0x29b   :  { %1322 = vmatprep.subr.bf16.mxu1 %v1841_v23 }
 0x29c   :  { %1883 = vrcp.f32 %v377_v24  ;;  %v1844_v24 = vld [vmem:[#allocation7 + $0x194] ss:$8 sps:$4 sm:$0xff]   ;;  %1323 = vmatpush1.bf16.msra.mxu1 %v1839_v25 }
 0x29d   :  { %1363 = vmatprep.subr.bf16.mxu0 %v1844_v24  ;;  %1324 = vmatprep.subr.bf16.mxu1 %v1847_v28 }
 0x29e   :  { %1364 = vmatpush1.bf16.msra.mxu0 %v1842_v26 }
 0x29f   :  { %1365 = vmatprep.subr.bf16.mxu0 %v1850_v29 }
 0x2a0   :  { %1325 = vmatpush1.bf16.msra.mxu1 %v1845_v31 }
 0x2a1   :  { %1326 = vmatprep.subr.bf16.mxu1 %v1853_v33 }
 0x2a2   :  { %1366 = vmatpush1.bf16.msra.mxu0 %v1848_v32 }
 0x2a3   :  { %1367 = vmatprep.subr.bf16.mxu0 %v1856_v34 }
 0x2a6   :  { %v1884_v36 = vpop.eup %1883 }
 0x2a7   :  { %v383_v37 = vrot.slane %v1884_v36, %v2158_v35  ;;  %v394_v40 = vrot.slane %v1884_v36, %v2162_v38  ;;  %v405_v41 = vrot.slane %v1884_v36, %v404_v39  ;;  %v416_v47 = vrot.slane %v1884_v36, %v415_v42  ;;  %v1859_v39 = vld [vmem:[#allocation7 + $0xc4] ss:$8 sps:$4 sm:$0xff]   ;;  %v1860_v42 = vld [vmem:[#allocation7 + $0x1c0] ss:$8 sps:$4 sm:$0xff]  }
 0x2a8   :  { %v427_v49 = vrot.slane %v1884_v36, %v426_v48  ;;  %v438_v53 = vrot.slane %v1884_v36, %v437_v50  ;;  %v449_v55 = vrot.slane %v1884_v36, %v448_v54  ;;  %v460_v57 = vrot.slane %v1884_v36, %v459_v56  ;;  %v1851_v36 = vld [vmem:[#allocation7 + $0xb0] ss:$8 sps:$4 sm:$0xff]   ;;  %v1874_v48 = vld [vmem:[#allocation7 + $0x1e4] ss:$8 sps:$4 sm:$0xff]   ;;  %v1872_v50 = vld [vmem:[#allocation7 + $0x1e0] ss:$8 sps:$4 sm:$0xff]  }
 0x2a9   :  { %389 = vbcast.lane.b32.xlu1 %v383_v37, 264  ;;  %385 = vbcast.lane.b32.xlu0 %v383_v37, 256  ;;  %v1854_v37 = vld [vmem:[#allocation7 + $0x1b0] ss:$8 sps:$4 sm:$0xff]  }
 0x2aa   :  { %1327 = vmatpush1.bf16.msra.mxu1 %v1851_v36  ;;  %1368 = vmatpush1.bf16.msra.mxu0 %v1854_v37 }
 0x2ab   :  { %1328 = vmatprep.subr.bf16.mxu1 %v1859_v39 }
 0x2ad   :  { %396 = vbcast.lane.b32.xlu1 %v394_v40, 256  ;;  %407 = vbcast.lane.b32.xlu0 %v405_v41, 256 }
 0x2b1   :  { %400 = vbcast.lane.b32.xlu1 %v394_v40, 264  ;;  %418 = vbcast.lane.b32.xlu0 %v416_v47, 256  ;;  %v1862_v40 = vld [vmem:[#allocation7 + $0x1c4] ss:$8 sps:$4 sm:$0xff]  }
 0x2b2   :  { %1369 = vmatprep.subr.bf16.mxu0 %v1862_v40 }
 0x2b3   :  { %1370 = vmatpush1.bf16.msra.mxu0 %v1860_v42 }
 0x2b4   :  { %1371 = vmatprep.subr.bf16.mxu0 %v1868_v46 }
 0x2b5   :  { %411 = vbcast.lane.b32.xlu1 %v405_v41, 264  ;;  %429 = vbcast.lane.b32.xlu0 %v427_v49, 256  ;;  %v1857_v41 = vld [vmem:[#allocation7 + $0xc0] ss:$8 sps:$4 sm:$0xff]  }
 0x2b6   :  { %1329 = vmatpush1.bf16.msra.mxu1 %v1857_v41 }
 0x2b7   :  { %1330 = vmatprep.subr.bf16.mxu1 %v1865_v43  ;;  %1372 = vmatpush1.bf16.msra.mxu0 %v1866_v45 }
 0x2b8   :  { %1373 = vmatprep.subr.bf16.mxu0 %v1874_v48 }
 0x2b9   :  { %422 = vbcast.lane.b32.xlu1 %v416_v47, 264  ;;  %440 = vbcast.lane.b32.xlu0 %v438_v53, 256  ;;  %v1871_v47 = vld [vmem:[#allocation7 + $0xe4] ss:$8 sps:$4 sm:$0xff]  }
 0x2ba   :  { %1331 = vmatpush1.bf16.msra.mxu1 %v1863_v44 }
 0x2bb   :  { %1332 = vmatprep.subr.bf16.mxu1 %v1871_v47  ;;  %1374 = vmatpush1.bf16.msra.mxu0 %v1872_v50 }
 0x2bc   :  { %1375 = vmatprep.subr.bf16.mxu0 %v1880_v27 }
 0x2bd   :  { %433 = vbcast.lane.b32.xlu1 %v427_v49, 264  ;;  %451 = vbcast.lane.b32.xlu0 %v449_v55, 256  ;;  %v1869_v49 = vld [vmem:[#allocation7 + $0xe0] ss:$8 sps:$4 sm:$0xff]  }
 0x2be   :  { %1333 = vmatpush1.bf16.msra.mxu1 %v1869_v49 }
 0x2bf   :  { %1334 = vmatprep.subr.bf16.mxu1 %v1877_v51  ;;  %1376 = vmatpush1.bf16.msra.mxu0 %v1878_v52 }
 0x2c1   :  { %444 = vbcast.lane.b32.xlu1 %v438_v53, 264  ;;  %462 = vbcast.lane.b32.xlu0 %v460_v57, 256 }
 0x2c2   :  { %1335 = vmatpush1.bf16.msra.mxu1 %v1875_v30 }
 0x2c5   :  { %455 = vbcast.lane.b32.xlu1 %v449_v55, 264 }
 0x2c9   :  { %466 = vbcast.lane.b32.xlu1 %v460_v57, 264 }
 0x31b   :  { %v390_v53 = vpop.permute.xlu1 %389  ;;  %v386_v54 = vpop.permute.xlu0 %385 }
 0x31c   :  { %v2172_v55 = vmul.f32 %v390_v53, %v2080_v8  ;;  %v2175_v56 = vmul.f32 %v390_v53, %v2082_v9  ;;  %v2178_v57 = vmul.f32 %v386_v54, %v2068_v2  ;;  %v2181_v58 = vmul.f32 %v386_v54, %v2072_v4 }
 0x31e   :  { %v500_v59 = vmax.f32 %v2178_v57, %v2172_v55  ;;  %v507_v60 = vmax.f32 %v2181_v58, %v2175_v56  ;;  %v701_v61 = vmin.f32 %v2178_v57, %v2172_v55  ;;  %v708_v8 = vmin.f32 %v2181_v58, %v2175_v56 }
 0x31f   :  { %v397_v9 = vpop.permute.xlu1 %396 }
 0x320   :  { %v501_v62 = vrot.slane %v500_v59, 4  ;;  %v508_v63 = vrot.slane %v507_v60, 4  ;;  %v702_v2 = vrot.slane %v701_v61, 4  ;;  %v709_v7 = vrot.slane %v708_v8, 4 }
 0x321   :  { %v2192_v16 = vmul.f32 %v397_v9, %v2064_v0  ;;  %v2195_v17 = vmul.f32 %v397_v9, %v2066_v1 }
 0x322   :  { %v502_v10 = vmax.f32 %v500_v59, %v501_v62  ;;  %v509_v4 = vmax.f32 %v507_v60, %v508_v63  ;;  %v703_v24 = vmin.f32 %v701_v61, %v702_v2  ;;  %v710_v25 = vmin.f32 %v708_v8, %v709_v7 }
 0x323   :  { %v401_v11 = vpop.permute.xlu1 %400 }
 0x324   :  { %v2198_v22 = vmul.f32 %v401_v11, %v2074_v5  ;;  %v2201_v23 = vmul.f32 %v401_v11, %v2076_v6  ;;  %v503_v29 = vrot.slane %v502_v10, 2  ;;  %v510_v0 = vrot.slane %v509_v4, 2  ;;  %v408_v6 = vpop.permute.xlu0 %407 }
 0x325   :  { %v704_v36 = vrot.slane %v703_v24, 2  ;;  %v711_v37 = vrot.slane %v710_v25, 2  ;;  %v2212_v53 = vmul.f32 %v408_v6, %v2092_v14  ;;  %v2215_v54 = vmul.f32 %v408_v6, %v2094_v15 }
 0x326   :  { %v514_v26 = vmax.f32 %v2192_v16, %v2198_v22  ;;  %v521_v28 = vmax.f32 %v2195_v17, %v2201_v23  ;;  %v715_v1 = vmin.f32 %v2192_v16, %v2198_v22  ;;  %v722_v5 = vmin.f32 %v2195_v17, %v2201_v23 }
 0x327   :  { %v504_v41 = vmax.f32 %v502_v10, %v503_v29  ;;  %v511_v42 = vmax.f32 %v509_v4, %v510_v0  ;;  %v705_v49 = vmin.f32 %v703_v24, %v704_v36  ;;  %v712_v50 = vmin.f32 %v710_v25, %v711_v37  ;;  %v412_v51 = vpop.permute.xlu1 %411 }
 0x328   :  { %v515_v31 = vrot.slane %v514_v26, 4  ;;  %v522_v32 = vrot.slane %v521_v28, 4  ;;  %v716_v33 = vrot.slane %v715_v1, 4  ;;  %v723_v34 = vrot.slane %v722_v5, 4  ;;  %v419_v52 = vpop.permute.xlu0 %418 }
 0x329   :  { %v505_v27 = vrot.slane %v504_v41, 1  ;;  %v512_v30 = vrot.slane %v511_v42, 1  ;;  %v2218_v9 = vmul.f32 %v412_v51, %v2088_v12  ;;  %v2221_v62 = vmul.f32 %v412_v51, %v2090_v13 }
 0x32a   :  { %v516_v39 = vmax.f32 %v514_v26, %v515_v31  ;;  %v523_v40 = vmax.f32 %v521_v28, %v522_v32  ;;  %v717_v43 = vmin.f32 %v715_v1, %v716_v33  ;;  %v724_v44 = vmin.f32 %v722_v5, %v723_v34 }
 0x32b   :  { %v706_v63 = vrot.slane %v705_v49, 1  ;;  %v713_v2 = vrot.slane %v712_v50, 1  ;;  %v2224_v7 = vmul.f32 %v419_v52, %v2104_v20  ;;  %v506_v14 = vmax.f32 %v504_v41, %v505_v27  ;;  %v423_v34 = vpop.permute.xlu1 %422 }
 0x32c   :  { %v517_v45 = vrot.slane %v516_v39, 2  ;;  %v524_v46 = vrot.slane %v523_v40, 2  ;;  %v718_v47 = vrot.slane %v717_v43, 2  ;;  %v725_v48 = vrot.slane %v724_v44, 2 }
 0x32d   :  { %v513_v10 = vmax.f32 %v511_v42, %v512_v30  ;;  %v528_v15 = vmax.f32 %v2212_v53, %v2218_v9  ;;  %v535_v4 = vmax.f32 %v2215_v54, %v2221_v62  ;;  %v729_v12 = vmin.f32 %v2212_v53, %v2218_v9 }
 0x32e   :  { %v518_v59 = vmax.f32 %v516_v39, %v517_v45  ;;  %v525_v60 = vmax.f32 %v523_v40, %v524_v46  ;;  %v719_v61 = vmin.f32 %v717_v43, %v718_v47  ;;  %v726_v8 = vmin.f32 %v724_v44, %v725_v48 }
 0x32f   :  { %v736_v13 = vmin.f32 %v2215_v54, %v2221_v62  ;;  %v529_v20 = vrot.slane %v528_v15, 4  ;;  %v536_v28 = vrot.slane %v535_v4, 4  ;;  %v707_v29 = vmin.f32 %v705_v49, %v706_v63 }
 0x330   :  { %v519_v11 = vrot.slane %v518_v59, 1  ;;  %v526_v24 = vrot.slane %v525_v60, 1  ;;  %v720_v25 = vrot.slane %v719_v61, 1  ;;  %v727_v26 = vrot.slane %v726_v8, 1 }
 0x331   :  { %v2235_v0 = vmul.f32 %v419_v52, %v2106_v21  ;;  %v730_v1 = vrot.slane %v729_v12, 4  ;;  %v737_v5 = vrot.slane %v736_v13, 4  ;;  %v2237_v31 = vpack.c.bf16 %v513_v10, %v506_v14 }
 0x332   :  { %v714_v32 = vmin.f32 %v712_v50, %v713_v2  ;;  %v530_v6 = vmax.f32 %v528_v15, %v529_v20  ;;  %v537_v33 = vmax.f32 %v535_v4, %v536_v28  ;;  %v520_v36 = vmax.f32 %v518_v59, %v519_v11  ;;  %v2347_v4 = vld [vmem:[#allocation4 + $0xc8] sm:$0xff] }
 0x333   :  { %v527_v37 = vmax.f32 %v525_v60, %v526_v24  ;;  %v731_v39 = vmin.f32 %v729_v12, %v730_v1  ;;  %v738_v40 = vmin.f32 %v736_v13, %v737_v5  ;;  %v721_v41 = vmin.f32 %v719_v61, %v720_v25  ;;  %v430_v24 = vpop.permute.xlu0 %429  ;;  %2715 = vst [vmem:[#allocation34_spill] sm:$0xff] %v2347_v4 }
 0x334   :  { %v728_v42 = vmin.f32 %v726_v8, %v727_v26  ;;  %v531_v43 = vrot.slane %v530_v6, 2  ;;  %v538_v44 = vrot.slane %v537_v33, 2  ;;  %v2240_v21 = vmul.f32 %v423_v34, %v2100_v18 }
 0x335   :  { %v732_v45 = vrot.slane %v731_v39, 2  ;;  %v739_v46 = vrot.slane %v738_v40, 2  ;;  %v2243_v47 = vmul.f32 %v423_v34, %v2102_v19  ;;  %v668_v50 = vunpack.c.l.b16 %v2237_v31 }
 0x336   :  { %2696 = vst [vmem:[#allocation15_spill] sm:$0xff] %v2240_v21  ;;  %v532_v48 = vmax.f32 %v530_v6, %v531_v43  ;;  %v539_v49 = vmax.f32 %v537_v33, %v538_v44  ;;  %v2246_v51 = vpack.c.bf16 %v714_v32, %v707_v29  ;;  %v542_v27 = vmax.f32 %v2224_v7, %v2240_v21 }
 0x337   :  { %2697 = vst [vmem:[#allocation16_spill] sm:$0xff] %v2243_v47  ;;  %v549_v30 = vmax.f32 %v2235_v0, %v2243_v47  ;;  %v733_v52 = vmin.f32 %v731_v39, %v732_v45  ;;  %v740_v59 = vmin.f32 %v738_v40, %v739_v46  ;;  %v743_v18 = vmin.f32 %v2224_v7, %v2240_v21  ;;  %v2265_v40 = vld [vmem:[#allocation4 + $0x80] sm:$0xff] }
 0x338   :  { %v750_v19 = vmin.f32 %v2235_v0, %v2243_v47  ;;  %v2256_v60 = vpack.c.bf16 %v527_v37, %v520_v36  ;;  %v2258_v61 = vpack.c.bf16 %v728_v42, %v721_v41  ;;  %v543_v8 = vrot.slane %v542_v27, 4  ;;  %v434_v37 = vpop.permute.xlu1 %433  ;;  %2698 = vst [vmem:[#allocation17_spill] sm:$0xff] %v2265_v40 }
 0x339   :  { %v550_v63 = vrot.slane %v549_v30, 4  ;;  %v533_v2 = vrot.slane %v532_v48, 1  ;;  %v540_v14 = vrot.slane %v539_v49, 1  ;;  %v744_v10 = vrot.slane %v743_v18, 4 }
 0x33a   :  { %v751_v15 = vrot.slane %v750_v19, 4  ;;  %v869_v11 = vunpack.c.l.b16 %v2246_v51  ;;  %v544_v12 = vmax.f32 %v542_v27, %v543_v8  ;;  %v734_v25 = vrot.slane %v733_v52, 1  ;;  %v2271_v27 = vld [vmem:[#allocation4 + $0x88] sm:$0xff] }
 0x33b   :  { %v551_v13 = vmax.f32 %v549_v30, %v550_v63  ;;  %v741_v26 = vrot.slane %v740_v59, 1  ;;  %v745_v20 = vmin.f32 %v743_v18, %v744_v10  ;;  %v670_v29 = vunpack.c.l.b16 %v2256_v60  ;;  %2699 = vst [vmem:[#allocation18_spill] sm:$0xff] %v2271_v27  ;;  %v441_v18 = vpop.permute.xlu0 %440  ;;  %v2282_v63 = vld [vmem:[#allocation4 + $0x98] sm:$0xff] }
 0x33c   :  { %v752_v28 = vmin.f32 %v750_v19, %v751_v15  ;;  %v871_v1 = vunpack.c.l.b16 %v2258_v61  ;;  %v545_v5 = vrot.slane %v544_v12, 2  ;;  %v534_v6 = vmax.f32 %v532_v48, %v533_v2  ;;  %v2277_v19 = vld [vmem:[#allocation4 + $0x90] sm:$0xff]  ;;  %2703 = vst [vmem:[#allocation22_spill] sm:$0xff] %v2282_v63  ;;  %v445_v39 = vpop.permute.xlu1 %444 }
 0x33d   :  { %v552_v32 = vrot.slane %v551_v13, 2  ;;  %v541_v33 = vmax.f32 %v539_v49, %v540_v14  ;;  %v746_v34 = vrot.slane %v745_v20, 2  ;;  %v2268_v41 = vmul.f32 %v2265_v40, %v430_v24  ;;  %2701 = vst [vmem:[#allocation20_spill] sm:$0xff] %v2277_v19 }
 0x33e   :  { %v753_v36 = vrot.slane %v752_v28, 2  ;;  %v546_v42 = vmax.f32 %v544_v12, %v545_v5  ;;  %v735_v45 = vmin.f32 %v733_v52, %v734_v25  ;;  %v742_v46 = vmin.f32 %v740_v59, %v741_v26  ;;  %v2301_v26 = vld [vmem:[#allocation4 + $0xa0] sm:$0xff] }
 0x33f   :  { %v553_v43 = vmax.f32 %v551_v13, %v552_v32  ;;  %v2274_v48 = vmul.f32 %v2271_v27, %v430_v24  ;;  %v747_v30 = vmin.f32 %v745_v20, %v746_v34  ;;  %v2280_v8 = vmul.f32 %v2277_v19, %v434_v37  ;;  %2705 = vst [vmem:[#allocation24_spill] sm:$0xff] %v2301_v26 }
 0x340   :  { %v2285_v2 = vmul.f32 %v2282_v63, %v434_v37  ;;  %v2288_v52 = vsel %vm258_vm2, %v670_v29, %v668_v50  ;;  %v2291_v59 = vsel %vm258_vm2, %v871_v1, %v869_v11  ;;  %v2293_v14 = vpack.c.bf16 %v541_v33, %v534_v6  ;;  %v2310_v29 = vld [vmem:[#allocation4 + $0xa8] sm:$0xff] }
 0x341   :  { %2700 = vst [vmem:[#allocation19_spill] sm:$0xff] %v2274_v48  ;;  %2702 = vst [vmem:[#allocation21_spill] sm:$0xff] %v2280_v8  ;;  %v754_v10 = vmin.f32 %v752_v28, %v753_v36  ;;  %v547_v15 = vrot.slane %v546_v42, 1  ;;  %v554_v24 = vrot.slane %v553_v43, 1  ;;  %v556_v12 = vmax.f32 %v2268_v41, %v2280_v8 }
 0x342   :  { %2704 = vst [vmem:[#allocation23_spill] sm:$0xff] %v2285_v2  ;;  %v563_v13 = vmax.f32 %v2274_v48, %v2285_v2  ;;  %v2299_v25 = vpack.c.bf16 %v742_v46, %v735_v45  ;;  %v2304_v50 = vmul.f32 %v2301_v26, %v441_v18  ;;  %v757_v11 = vmin.f32 %v2268_v41, %v2280_v8 }
 0x343   :  { %v764_v20 = vmin.f32 %v2274_v48, %v2285_v2  ;;  %v748_v28 = vrot.slane %v747_v30, 1  ;;  %2707 = vst [vmem:[#allocation26_spill] sm:$0xff] %v2310_v29  ;;  %v2313_v1 = vmul.f32 %v2310_v29, %v441_v18  ;;  %v557_v5 = vrot.slane %v556_v12, 4  ;;  %v2319_v29 = vld [vmem:[#allocation4 + $0xb0] sm:$0xff] }
 0x344   :  { %2706 = vst [vmem:[#allocation25_spill] sm:$0xff] %v2304_v50  ;;  %v564_v32 = vrot.slane %v563_v13, 4  ;;  %v755_v33 = vrot.slane %v754_v10, 1  ;;  %v758_v34 = vrot.slane %v757_v11, 4  ;;  %v548_v37 = vmax.f32 %v546_v42, %v547_v15  ;;  %2709 = vst [vmem:[#allocation28_spill] sm:$0xff] %v2319_v29 }
 0x345   :  { %2708 = vst [vmem:[#allocation27_spill] sm:$0xff] %v2313_v1  ;;  %v765_v36 = vrot.slane %v764_v20, 4  ;;  %v555_v45 = vmax.f32 %v553_v43, %v554_v24  ;;  %v558_v46 = vmax.f32 %v556_v12, %v557_v5  ;;  %v749_v63 = vmin.f32 %v747_v30, %v748_v28  ;;  %v2324_v43 = vld [vmem:[#allocation4 + $0xb8] sm:$0xff]  ;;  %v452_v30 = vpop.permute.xlu0 %451 }
 0x346   :  { %v565_v49 = vmax.f32 %v563_v13, %v564_v32  ;;  %v759_v38 = vmin.f32 %v757_v11, %v758_v34  ;;  %v2322_v42 = vmul.f32 %v2319_v29, %v445_v39  ;;  %2711 = vst [vmem:[#allocation30_spill] sm:$0xff] %v2324_v43  ;;  %v2327_v15 = vmul.f32 %v2324_v43, %v445_v39 }
 0x347   :  { %v766_v35 = vmin.f32 %v764_v20, %v765_v36  ;;  %v559_v2 = vrot.slane %v558_v46, 2  ;;  %v2329_v24 = vpack.c.bf16 %v555_v45, %v548_v37  ;;  %v756_v12 = vmin.f32 %v754_v10, %v755_v33 }
 0x348   :  { %v566_v19 = vrot.slane %v565_v49, 2  ;;  %v760_v6 = vrot.slane %v759_v38, 2  ;;  %2710 = vst [vmem:[#allocation29_spill] sm:$0xff] %v2322_v42  ;;  %2712 = vst [vmem:[#allocation31_spill] sm:$0xff] %v2327_v15  ;;  %v570_v5 = vmax.f32 %v2304_v50, %v2322_v42  ;;  %v577_v32 = vmax.f32 %v2313_v1, %v2327_v15 }
 0x349   :  { %v767_v8 = vrot.slane %v766_v35, 2  ;;  %v560_v13 = vmax.f32 %v558_v46, %v559_v2  ;;  %v771_v39 = vmin.f32 %v2304_v50, %v2322_v42  ;;  %v778_v37 = vmin.f32 %v2313_v1, %v2327_v15  ;;  %v463_v42 = vpop.permute.xlu0 %462  ;;  %v2393_v46 = vld [vmem:[#allocation4 + $0xe8] sm:$0xff] }
 0x34a   :  { %v567_v11 = vmax.f32 %v565_v49, %v566_v19  ;;  %v761_v20 = vmin.f32 %v759_v38, %v760_v6  ;;  %v571_v49 = vrot.slane %v570_v5, 4  ;;  %v578_v19 = vrot.slane %v577_v32, 4  ;;  %v456_v38 = vpop.permute.xlu1 %455  ;;  %2726 = vst [vmem:[#allocation45_spill] sm:$0xff] %v2393_v46 }
 0x34b   :  { %v768_v28 = vmin.f32 %v766_v35, %v767_v8  ;;  %v561_v34 = vrot.slane %v560_v13, 1  ;;  %v2339_v35 = vpack.c.bf16 %v756_v12, %v749_v63  ;;  %v2341_v8 = vld [vmem:[#allocation4 + $0xc0] sm:$0xff]  ;;  %v772_v33 = vrot.slane %v771_v39, 4 }
 0x34c   :  { %v568_v36 = vrot.slane %v567_v11, 1  ;;  %v762_v10 = vrot.slane %v761_v20, 1  ;;  %2713 = vst [vmem:[#allocation32_spill] sm:$0xff] %v2341_v8  ;;  %v2344_v6 = vmul.f32 %v2341_v8, %v452_v30  ;;  %v779_v45 = vrot.slane %v778_v37, 4 }
 0x34d   :  { %v769_v2 = vrot.slane %v768_v28, 1  ;;  %v2350_v18 = vmul.f32 %v2347_v4, %v452_v30  ;;  %v572_v44 = vmax.f32 %v570_v5, %v571_v49  ;;  %v579_v43 = vmax.f32 %v577_v32, %v578_v19  ;;  %v2355_v32 = vld [vmem:[#allocation4 + $0xe0] sm:$0xff]  ;;  %v2378_v49 = vld [vmem:[#allocation4 + $0xf0] sm:$0xff] }
 0x34e   :  { %2714 = vst [vmem:[#allocation33_spill] sm:$0xff] %v2344_v6  ;;  %v562_v15 = vmax.f32 %v560_v13, %v561_v34  ;;  %v569_v29 = vmax.f32 %v567_v11, %v568_v36  ;;  %v773_v63 = vmin.f32 %v771_v39, %v772_v33  ;;  %v780_v12 = vmin.f32 %v778_v37, %v779_v45  ;;  %v467_v11 = vpop.permute.xlu1 %466  ;;  %v2360_v34 = vld [vmem:[#allocation4 + $0xd0] sm:$0xff]  ;;  %v2365_v39 = vld [vmem:[#allocation4 + $0xd8] sm:$0xff] }
 0x34f   :  { %2716 = vst [vmem:[#allocation35_spill] sm:$0xff] %v2350_v18  ;;  %v763_v1 = vmin.f32 %v761_v20, %v762_v10  ;;  %v770_v26 = vmin.f32 %v768_v28, %v769_v2  ;;  %v573_v8 = vrot.slane %v572_v44, 2  ;;  %v580_v50 = vrot.slane %v579_v43, 2  ;;  %2717 = vst [vmem:[#allocation36_spill] sm:$0xff] %v2355_v32 }
 0x350   :  { %v774_v21 = vrot.slane %v773_v63, 2  ;;  %v781_v27 = vrot.slane %v780_v12, 2  ;;  %v2358_v13 = vmul.f32 %v2355_v32, %v463_v42  ;;  %2718 = vst [vmem:[#allocation37_spill] sm:$0xff] %v2360_v34  ;;  %v2363_v36 = vmul.f32 %v2360_v34, %v456_v38  ;;  %2720 = vst [vmem:[#allocation39_spill] sm:$0xff] %v2365_v39 }
 0x351   :  { %v574_v4 = vmax.f32 %v572_v44, %v573_v8  ;;  %v581_v5 = vmax.f32 %v579_v43, %v580_v50  ;;  %v2368_v37 = vmul.f32 %v2365_v39, %v456_v38  ;;  %v2370_v44 = vpack.c.bf16 %v569_v29, %v562_v15  ;;  %2722 = vst [vmem:[#allocation41_spill] sm:$0xff] %v2378_v49 }
 0x352   :  { %v775_v20 = vmin.f32 %v773_v63, %v774_v21  ;;  %v782_v28 = vmin.f32 %v780_v12, %v781_v27  ;;  %2719 = vst [vmem:[#allocation38_spill] sm:$0xff] %v2363_v36  ;;  %v2372_v50 = vpack.c.bf16 %v770_v26, %v763_v1  ;;  %v584_v21 = vmax.f32 %v2344_v6, %v2363_v36  ;;  %v2387_v1 = vld [vmem:[#allocation4 + $0xf8] sm:$0xff] }
 0x353   :  { %2721 = vst [vmem:[#allocation40_spill] sm:$0xff] %v2368_v37  ;;  %v575_v43 = vrot.slane %v574_v4, 1  ;;  %v582_v10 = vrot.slane %v581_v5, 1  ;;  %v591_v27 = vmax.f32 %v2350_v18, %v2368_v37  ;;  %v2381_v19 = vmul.f32 %v2378_v49, %v467_v11  ;;  %2724 = vst [vmem:[#allocation43_spill] sm:$0xff] %v2387_v1 }
 0x354   :  { %v776_v2 = vrot.slane %v775_v20, 1  ;;  %v783_v38 = vrot.slane %v782_v28, 1  ;;  %v785_v29 = vmin.f32 %v2344_v6, %v2363_v36  ;;  %v792_v26 = vmin.f32 %v2350_v18, %v2368_v37 }
 0x355   :  { %2723 = vst [vmem:[#allocation42_spill] sm:$0xff] %v2381_v19  ;;  %v2390_v15 = vmul.f32 %v2387_v1, %v467_v11  ;;  %v576_v8 = vmax.f32 %v574_v4, %v575_v43  ;;  %v583_v33 = vmax.f32 %v581_v5, %v582_v10  ;;  %v585_v45 = vrot.slane %v584_v21, 4 }
 0x356   :  { %v592_v63 = vrot.slane %v591_v27, 4  ;;  %v2396_v30 = vmul.f32 %v2393_v46, %v463_v42  ;;  %v786_v47 = vrot.slane %v785_v29, 4  ;;  %v793_v49 = vrot.slane %v792_v26, 4 }
 0x357   :  { %2725 = vst [vmem:[#allocation44_spill] sm:$0xff] %v2390_v15  ;;  %v777_v37 = vmin.f32 %v775_v20, %v776_v2  ;;  %v586_v34 = vmax.f32 %v584_v21, %v585_v45  ;;  %v784_v11 = vmin.f32 %v782_v28, %v783_v38  ;;  %v598_v5 = vmax.f32 %v2358_v13, %v2381_v19 }
 0x358   :  { %2727 = vst [vmem:[#allocation46_spill] sm:$0xff] %v2396_v30  ;;  %v593_v36 = vmax.f32 %v591_v27, %v592_v63  ;;  %v787_v1 = vmin.f32 %v785_v29, %v786_v47  ;;  %v794_v4 = vmin.f32 %v792_v26, %v793_v49  ;;  %v2401_v43 = vpack.c.bf16 %v583_v33, %v576_v8 }
 0x359   :  { %v587_v10 = vrot.slane %v586_v34, 2  ;;  %v605_v42 = vmax.f32 %v2396_v30, %v2390_v15  ;;  %v599_v18 = vrot.slane %v598_v5, 4  ;;  %v799_v20 = vmin.f32 %v2358_v13, %v2381_v19 }
 0x35a   :  { %v594_v12 = vrot.slane %v593_v36, 2  ;;  %v788_v46 = vrot.slane %v787_v1, 2  ;;  %v795_v32 = vrot.slane %v794_v4, 2  ;;  %v806_v21 = vmin.f32 %v2396_v30, %v2390_v15 }
 0x35b   :  { %v588_v2 = vmax.f32 %v586_v34, %v587_v10  ;;  %v606_v47 = vrot.slane %v605_v42, 4  ;;  %v600_v38 = vmax.f32 %v598_v5, %v599_v18  ;;  %v800_v29 = vrot.slane %v799_v20, 4 }
 0x35c   :  { %v595_v28 = vmax.f32 %v593_v36, %v594_v12  ;;  %v789_v27 = vmin.f32 %v787_v1, %v788_v46  ;;  %v796_v49 = vmin.f32 %v794_v4, %v795_v32  ;;  %v807_v45 = vrot.slane %v806_v21, 4 }
 0x35d   :  { %v589_v26 = vrot.slane %v588_v2, 1  ;;  %v607_v33 = vmax.f32 %v605_v42, %v606_v47  ;;  %v601_v6 = vrot.slane %v600_v38, 2  ;;  %v801_v48 = vmin.f32 %v799_v20, %v800_v29 }
 0x35e   :  { %v596_v8 = vrot.slane %v595_v28, 1  ;;  %v790_v63 = vrot.slane %v789_v27, 1  ;;  %v797_v39 = vrot.slane %v796_v49, 1  ;;  %v808_v36 = vmin.f32 %v806_v21, %v807_v45 }
 0x35f   :  { %v590_v40 = vmax.f32 %v588_v2, %v589_v26  ;;  %v608_v34 = vrot.slane %v607_v33, 2  ;;  %v678_v12 = vunpack.c.l.b16 %v2401_v43  ;;  %v2410_v10 = vpack.c.bf16 %v784_v11, %v777_v37 }
 0x360   :  { %v597_v19 = vmax.f32 %v595_v28, %v596_v8  ;;  %v602_v46 = vmax.f32 %v600_v38, %v601_v6  ;;  %v802_v32 = vrot.slane %v801_v48, 2  ;;  %v791_v18 = vmin.f32 %v789_v27, %v790_v63 }
 0x361   :  { %v798_v1 = vmin.f32 %v796_v49, %v797_v39  ;;  %v609_v4 = vmax.f32 %v607_v33, %v608_v34  ;;  %v809_v5 = vrot.slane %v808_v36, 2  ;;  %v677_v30 = vunpack.c.h.b16 %v2370_v44 }
 0x362   :  { %v603_v42 = vrot.slane %v602_v46, 1  ;;  %v803_v47 = vmin.f32 %v801_v48, %v802_v32  ;;  %v1740_v15 = vpack.c.bf16 %v597_v19, %v590_v40  ;;  %v679_v28 = vunpack.c.h.b16 %v2401_v43 }
 0x363   :  { %v610_v20 = vrot.slane %v609_v4, 1  ;;  %v810_v2 = vmin.f32 %v808_v36, %v809_v5  ;;  %v2728_v21 = vunpack.c.h.b16 %v2237_v31  ;;  %v2729_v37 = vunpack.c.h.b16 %v2256_v60 }
 0x364   :  { %v604_v11 = vmax.f32 %v602_v46, %v603_v42  ;;  %v804_v27 = vrot.slane %v803_v47, 1  ;;  %v681_v39 = vunpack.c.h.b16 %v1740_v15  ;;  %v2730_v49 = vunpack.c.h.b16 %v2293_v14 }
 0x365   :  { %v691_v6 = vsel %vm258_vm2, %v2729_v37, %v2728_v21  ;;  %v611_v40 = vmax.f32 %v609_v4, %v610_v20  ;;  %v811_v19 = vrot.slane %v810_v2, 1  ;;  %v2731_v38 = vunpack.c.h.b16 %v2329_v24 }
 0x366   :  { %v692_v48 = vsel %vm260_vm3, %v2730_v49, %v691_v6  ;;  %v1748_v43 = vpack.c.bf16 %v798_v1, %v791_v18  ;;  %v879_v31 = vunpack.c.l.b16 %v2410_v10  ;;  %v805_v26 = vmin.f32 %v803_v47, %v804_v27 }
 0x367   :  { %v693_v29 = vsel %vm262_vm4, %v2731_v38, %v692_v48  ;;  %v878_v8 = vunpack.c.h.b16 %v2372_v50  ;;  %v812_v33 = vmin.f32 %v810_v2, %v811_v19  ;;  %v1741_v45 = vpack.c.bf16 %v611_v40, %v604_v11 }
 0x368   :  { %v694_v60 = vsel %vm264_vm5, %v677_v30, %v693_v29  ;;  %v880_v34 = vunpack.c.h.b16 %v2410_v10  ;;  %v882_v46 = vunpack.c.h.b16 %v1748_v43  ;;  %v2732_v32 = vunpack.c.h.b16 %v2246_v51 }
 0x369   :  { %v695_v63 = vsel %vm266_vm6, %v679_v28, %v694_v60  ;;  %v2733_v18 = vunpack.c.h.b16 %v2258_v61  ;;  %v680_v4 = vunpack.c.l.b16 %v1740_v15  ;;  %v683_v5 = vunpack.c.h.b16 %v1741_v45 }
 0x36a   :  { %v696_v36 = vsel %vm268_vm7, %v681_v39, %v695_v63  ;;  %v1749_v30 = vpack.c.bf16 %v812_v33, %v805_v26  ;;  %v2734_v42 = vunpack.c.h.b16 %v2299_v25  ;;  %v2735_v20 = vunpack.c.l.b16 %v2293_v14 }
 0x36b   :  { %v892_v1 = vsel %vm258_vm2, %v2733_v18, %v2732_v32  ;;  %v2736_v2 = vunpack.c.h.b16 %v2339_v35  ;;  %v682_v28 = vunpack.c.l.b16 %v1741_v45  ;;  %v2737_v61 = vunpack.c.l.b16 %v2329_v24 }
 0x36c   :  { %v893_v47 = vsel %vm260_vm3, %v2734_v42, %v892_v1  ;;  %v685_v10 = vsel %vm260_vm3, %v2735_v20, %v2288_v52  ;;  %v881_v21 = vunpack.c.l.b16 %v1748_v43  ;;  %v697_v37 = vsel %vm270_vm8, %v683_v5, %v696_v36 }
 0x36d   :  { %v894_v51 = vsel %vm262_vm4, %v2736_v2, %v893_v47  ;;  %v686_v15 = vsel %vm262_vm4, %v2737_v61, %v685_v10  ;;  %v884_v6 = vunpack.c.h.b16 %v1749_v30  ;;  %v2738_v27 = vunpack.c.l.b16 %v2370_v44 }
 0x36e   :  { %v895_v11 = vsel %vm264_vm5, %v878_v8, %v894_v51  ;;  %v1751_v52 = vpack.c.b16 %v697_v37, %v697_v37  ;;  %v2739_v24 = vunpack.c.l.b16 %v2299_v25  ;;  %v883_v38 = vunpack.c.l.b16 %v1749_v30  ;;  %v1909_v37 = vld [vmem:[#allocation4 + $0x10] sm:$0xff] }
 0x36f   :  { %v687_v14 = vsel %vm264_vm5, %v2738_v27, %v686_v15  ;;  %v896_v39 = vsel %vm266_vm6, %v880_v34, %v895_v11  ;;  %v2740_v29 = vunpack.c.l.b16 %v2339_v35  ;;  %v969_v63 = vstv %s2656_s4  ;;  %v1910_v11 = vld [vmem:[#allocation4 + $0x18] sm:$0xff]  ;;  %s2006_s4 = smov [#allocation9]  }
 0x370   :  { %v688_v49 = vsel %vm266_vm6, %v678_v12, %v687_v14  ;;  %v886_v48 = vsel %vm260_vm3, %v2739_v24, %v2291_v59  ;;  %v897_v40 = vsel %vm268_vm7, %v882_v46, %v896_v39  ;;  %1336 = vmatprep.mubr.bf16.mxu1 %v1751_v52  ;;  %v2741_v12 = vunpack.c.l.b16 %v2372_v50  ;;  %v1911_v14 = vld [vmem:[#allocation4] sm:$0xff]  ;;  %v1912_v39 = vld [vmem:[#allocation4 + $0x8] sm:$0xff]  ;;  %s1631_s23 = sshll.u32 %s2006_s4, 4  ;;  %s1632_s23 = int_to_ptr.vmem [resolvable:$true] %s1631_s23 }
 0x371   :  { %v689_v19 = vsel %vm268_vm7, %v680_v4, %v688_v49  ;;  %v887_v44 = vsel %vm262_vm4, %v2740_v29, %v886_v48  ;;  %v898_v43 = vsel %vm270_vm8, %v884_v6, %v897_v40  ;;  %v2005_v61 = vmov 1966171168   ;;  %v1913_v24 = vld [vmem:[#allocation4 + $0x20] sm:$0xff]  ;;  %v1914_v40 = vld [vmem:[#allocation4 + $0x28] sm:$0xff]  ;;  %v1917_v29 = vld [vmem:[#allocation4 + $0x30] sm:$0xff]  ;;  %s1969_s24 = scalar_lea.vmem %s1632_s23, 4096  ;;  %p1974_p3 = scmp.lt.s32.totalorder %s1632_s23, %s1632_s23 }
 0x372   :  { %v690_v26 = vsel %vm270_vm8, %v682_v28, %v689_v19  ;;  %v888_v25 = vsel %vm264_vm5, %v2741_v12, %v887_v44  ;;  %v1753_v60 = vpack.c.b16 %v898_v43, %v898_v43  ;;  %v1435_v15 = vunpack.c.l.s4 %v2005_v61  ;;  %v1915_v19 = vld [vmem:[#allocation4 + $0x40] sm:$0xff]  ;;  %v1918_v43 = vld [vmem:[#allocation4 + $0x38] sm:$0xff]  ;;  %v1920_v12 = vld [vmem:[#allocation4 + $0x68] sm:$0xff]  ;;  %p1970_p2 = scmp.ne.s32.totalorder %s1632_s23, %s1969_s24  ;;  %p1975_p4 = scmp.lt.s32.totalorder %s1969_s24, %s1969_s24 }
 0x373   :  { %v1750_v59 = vpack.c.b16 %v690_v26, %v690_v26  ;;  %v889_v8 = vsel %vm266_vm6, %v879_v31, %v888_v25  ;;  %v2477_v6 = vmul.f32 %v1909_v37, %v2172_v55  ;;  %v2480_v27 = vmul.f32 %v1910_v11, %v2175_v56  ;;  %v1919_v26 = vld [vmem:[#allocation4 + $0x60] sm:$0xff]  ;;  %v2758_v61 = vld [vmem:[#allocation34_spill] sm:$0xff] }
 0x374   :  { %v890_v33 = vsel %vm268_vm7, %v881_v21, %v889_v8  ;;  %1377 = vmatprep.mubr.bf16.mxu0 %v1753_v60  ;;  %v1436_v21 = vunpack.c.0.s8 %v1435_v15  ;;  %v2483_v52 = vmul.f32 %v1911_v14, %v2178_v57  ;;  %v2486_v49 = vmul.f32 %v1912_v39, %v2181_v58  ;;  %v1921_v60 = vld [vmem:[#allocation4 + $0x50] sm:$0xff]  ;;  %v2759_v11 = vld [vmem:[#allocation29_spill] sm:$0xff]  ;;  %v2760_v14 = vld [vmem:[#allocation28_spill] sm:$0xff]  ;;  %p1976_p5 = por %p1975_p4, %p1974_p3 }
 0x375   :  { %1337 = vmatmul.mubr.bf16.vlgmr.msra.gmra.mrb[4].mxu1 %v1750_v59  ;;  %v891_v35 = vsel %vm270_vm8, %v883_v38, %v890_v33  ;;  %v2489_v48 = vmul.f32 %v1913_v24, %v2192_v16  ;;  %v2492_v55 = vmul.f32 %v1914_v40, %v2195_v17  ;;  %v2495_v56 = vmul.f32 %v1915_v19, %v2212_v53  ;;  %v1916_v38 = vld [vmem:[#allocation4 + $0x48] sm:$0xff]  ;;  %v1922_v59 = vld [vmem:[#allocation4 + $0x58] sm:$0xff]  ;;  %v2761_v24 = vld [vmem:[#allocation31_spill] sm:$0xff] }
 0x376   :  { %v1752_v45 = vpack.c.b16 %v891_v35, %v891_v35  ;;  %v2498_v57 = vmul.f32 %v1916_v38, %v2215_v54  ;;  %v2501_v58 = vmul.f32 %v1917_v29, %v2198_v22  ;;  %v2504_v16 = vmul.f32 %v1918_v43, %v2201_v23  ;;  %v2742_v23 = vld [vmem:[#allocation17_spill] sm:$0xff]  ;;  %v2744_v35 = vld [vmem:[#allocation18_spill] sm:$0xff]  ;;  %v2763_v38 = vld [vmem:[#allocation36_spill] sm:$0xff]  ;;  %p1977_p6 = pnand %p1976_p5, %p1970_p2 }
 0x377   :  { %v2507_v17 = vmul.f32 %v1919_v26, %v2224_v7  ;;  %v2510_v53 = vmul.f32 %v1920_v12, %v2235_v0  ;;  %v1439_v54 = vsub.s32 %v1436_v21, %v2115_v3  ;;  %v2514_v22 = vmul.f32 %v1921_v60, %v2218_v9  ;;  %v2743_v7 = vld [vmem:[#allocation19_spill] sm:$0xff]  ;;  %v2762_v40 = vld [vmem:[#allocation30_spill] sm:$0xff]  ;;  %v2765_v43 = vld [vmem:[#allocation45_spill] sm:$0xff] }
 0x378   :  { %1378 = vmatmul.mubr.bf16.vlgmr.msra.gmra.mrb[4].mxu0 %v1752_v45  ;;  %v2517_v8 = vmul.f32 %v1922_v59, %v2221_v62  ;;  %v2521_v33 = vmul.f32 %v2742_v23, %v2268_v41  ;;  %v2525_v45 = vmul.f32 %v2744_v35, %v2743_v7  ;;  %v1923_v0 = vld [vmem:[#allocation4 + $0x70] sm:$0xff]  ;;  %v2747_v62 = vld [vmem:[#allocation25_spill] sm:$0xff]  ;;  %v2559_v39 = vmul.f32 %v2760_v14, %v2759_v11  ;;  %v2766_v23 = vld [vmem:[#allocation38_spill] sm:$0xff] }
 0x379   :  { %v2749_v41 = vld [vmem:[#allocation27_spill] sm:$0xff]  ;;  %v2563_v19 = vmul.f32 %v2762_v40, %v2761_v24  ;;  %v2567_v29 = vmul.f32 %v2763_v38, %v2358_v13  ;;  %v2767_v7 = vld [vmem:[#allocation37_spill] sm:$0xff] }
 0x37a   :  { %v2575_v35 = vmul.f32 %v2767_v7, %v2766_v23 }
 0x448   :  { %v1338_v34 = vpop.f32.mrb[4].mxu1 }
 0x449   :  { %v1339_v50 = vadd.f32 %v1338_v34, %v969_v63  ;;  %v1340_v36 = vpop.f32.mrb[5].mxu1  ;;  %v1924_v34 = vld [vmem:[#allocation4 + $0x78] sm:$0xff] }
 0x44a   :  { %v1341_v46 = vadd.f32 %v1340_v36, %v969_v63  ;;  %v1342_v32 = vpop.f32.mrb[6].mxu1  ;;  %v2745_v63 = vld [vmem:[#allocation15_spill] sm:$0xff] }
 0x44b   :  { %v1379_v18 = vpop.f32.mrb[4].mxu0  ;;  %v1343_v1 = vpop.f32.mrb[7].mxu1  ;;  %v2528_v3 = vmul.f32 %v1923_v0, %v2745_v63  ;;  %v2748_v32 = vld [vmem:[#allocation24_spill] sm:$0xff]  ;;  %v2769_v63 = vld [vmem:[#allocation39_spill] sm:$0xff] }
 0x44c   :  { %v1380_v31 = vadd.f32 %v1379_v18, %v1339_v50  ;;  %v1381_v4 = vpop.f32.mrb[5].mxu0  ;;  %v2746_v50 = vld [vmem:[#allocation16_spill] sm:$0xff]  ;;  %v2535_v18 = vmul.f32 %v2748_v32, %v2747_v62  ;;  %v2750_v1 = vld [vmem:[#allocation26_spill] sm:$0xff]  ;;  %v2773_v62 = vld [vmem:[#allocation43_spill] sm:$0xff] }
 0x44d   :  { %v1382_v5 = vadd.f32 %v1381_v4, %v1341_v46  ;;  %v1383_v30 = vpop.f32.mrb[6].mxu0  ;;  %v2531_v9 = vmul.f32 %v1924_v34, %v2746_v50  ;;  %v2751_v4 = vld [vmem:[#allocation21_spill] sm:$0xff]  ;;  %v2768_v0 = vld [vmem:[#allocation40_spill] sm:$0xff]  ;;  %v2770_v50 = vld [vmem:[#allocation42_spill] sm:$0xff] }
 0x44e   :  { %v1732_v42 = vmul.f32 -1.442695, %v1380_v31  ;;  %v1384_v47 = vpop.f32.mrb[7].mxu0  ;;  %v2539_v31 = vmul.f32 %v2750_v1, %v2749_v41  ;;  %v2579_v34 = vmul.f32 %v2769_v63, %v2768_v0 }
 0x44f   :  { %v1733_v20 = vmul.f32 -1.442695, %v1382_v5  ;;  %v2752_v5 = vld [vmem:[#allocation20_spill] sm:$0xff]  ;;  %v2754_v47 = vld [vmem:[#allocation22_spill] sm:$0xff] }
 0x450   :  { %1885 = vpow2.f32 %v1732_v42  ;;  %v2543_v30 = vmul.f32 %v2752_v5, %v2751_v4  ;;  %v2753_v42 = vld [vmem:[#allocation23_spill] sm:$0xff] }
 0x451   :  { %1887 = vpow2.f32 %v1733_v20  ;;  %v2547_v20 = vmul.f32 %v2754_v47, %v2753_v42  ;;  %v2774_v42 = vld [vmem:[#allocation13_spill] sm:$0xff] }
 0x45a   :  { %v1886_v10 = vpop.eup %1885 }
 0x45b   :  { %v1888_v2 = vpop.eup %1887  ;;  %v1392_v51 = vadd.f32 1.0, %v1886_v10  ;;  %v2755_v10 = vld [vmem:[#allocation33_spill] sm:$0xff] }
 0x45c   :  { %v1393_v28 = vadd.f32 1.0, %v1888_v2  ;;  %v2756_v2 = vld [vmem:[#allocation32_spill] sm:$0xff] }
 0x45d   :  { %1889 = vrcp.f32 %v1392_v51  ;;  %v2551_v51 = vmul.f32 %v2756_v2, %v2755_v10  ;;  %v2775_v10 = vld [vmem:[#allocation14_spill] sm:$0xff] }
 0x45e   :  { %1891 = vrcp.f32 %v1393_v28  ;;  %v2757_v28 = vld [vmem:[#allocation35_spill] sm:$0xff] }
 0x45f   :  { %v2555_v15 = vmul.f32 %v2758_v61, %v2757_v28 }
 0x467   :  { %v1890_v44 = vpop.eup %1889 }
 0x468   :  { %v1892_v25 = vpop.eup %1891 }
 0x469   :  { %v1432_v36 = vcombine.low %v1890_v44, %v1892_v25  ;;  %v1433_v46 = vcombine.high %v1890_v44, %v1892_v25  ;;  %v2764_v44 = vld [vmem:[#allocation46_spill] sm:$0xff] }
 0x46a   :  { %v2571_v26 = vmul.f32 %v2765_v43, %v2764_v44 }
 0x46b   :  { %v1440_v21 = vrot.slane %v1432_v36, %v1439_v54  ;;  %v1447_v37 = vrot.slane %v1433_v46, %v1439_v54  ;;  %v2771_v36 = vld [vmem:[#allocation41_spill] sm:$0xff]  ;;  %v2772_v46 = vld [vmem:[#allocation44_spill] sm:$0xff] }
 0x46c   :  { %v2583_v13 = vmul.f32 %v2771_v36, %v2770_v50  ;;  %v2587_v32 = vmul.f32 %v2773_v62, %v2772_v46 }
 0x46d   :  { %v1448_v12 = vcombine.high %v1440_v21, %v1440_v21  ;;  %v1449_v25 = vcombine.high %v1447_v37, %v1447_v37  ;;  %v1456_v60 = vrot.slane %v1440_v21, %v1439_v54  ;;  %v1463_v59 = vrot.slane %v1447_v37, %v1439_v54 }
 0x46f   :  { %v1470_v41 = vrot.slane %v1448_v12, %v1439_v54  ;;  %v1477_v1 = vrot.slane %v1449_v25, %v1439_v54  ;;  %v1478_v4 = vcombine.high %v1456_v60, %v1456_v60  ;;  %v1479_v5 = vcombine.high %v1463_v59, %v1463_v59 }
 0x470   :  { %v1485_v47 = vrot.slane %v1456_v60, %v2774_v42  ;;  %v1489_v2 = vrot.slane %v1456_v60, %v2775_v10  ;;  %v1517_v28 = vrot.slane %v1463_v59, %v2774_v42  ;;  %v1521_v61 = vrot.slane %v1463_v59, %v2775_v10 }
 0x471   :  { %v1480_v21 = vcombine.high %v1470_v41, %v1470_v41  ;;  %v1481_v37 = vcombine.high %v1477_v1, %v1477_v1  ;;  %v1493_v11 = vrot.slane %v1470_v41, %v2774_v42  ;;  %v1497_v14 = vrot.slane %v1470_v41, %v2775_v10 }
 0x472   :  { %v1501_v24 = vrot.slane %v1478_v4, %v2774_v42  ;;  %v1505_v54 = vrot.slane %v1478_v4, %v2775_v10  ;;  %v1525_v40 = vrot.slane %v1477_v1, %v2774_v42  ;;  %v1529_v38 = vrot.slane %v1477_v1, %v2775_v10 }
 0x473   :  { %v1509_v44 = vrot.slane %v1480_v21, %v2774_v42  ;;  %v1513_v43 = vrot.slane %v1480_v21, %v2775_v10  ;;  %v1533_v12 = vrot.slane %v1479_v5, %v2774_v42  ;;  %v1537_v25 = vrot.slane %v1479_v5, %v2775_v10 }
 0x474   :  { %v1541_v60 = vrot.slane %v1481_v37, %v2774_v42  ;;  %v1545_v59 = vrot.slane %v1481_v37, %v2775_v10  ;;  %v1562_v23 = vmul.f32 %v1485_v47, %v2483_v52  ;;  %v1563_v7 = vmul.f32 %v1489_v2, %v2486_v49 }
 0x475   :  { %v1564_v0 = vmul.f32 %v1485_v47, %v2477_v6  ;;  %v1565_v63 = vmul.f32 %v1489_v2, %v2480_v27  ;;  %v1566_v50 = vmul.f32 %v1493_v11, %v2489_v48  ;;  %v1567_v36 = vmul.f32 %v1497_v14, %v2492_v55 }
 0x476   :  { %v1568_v46 = vmul.f32 %v1493_v11, %v2501_v58  ;;  %v1569_v62 = vmul.f32 %v1497_v14, %v2504_v16  ;;  %v1570_v41 = vmul.f32 %v1501_v24, %v2495_v56  ;;  %v1571_v1 = vmul.f32 %v1505_v54, %v2498_v57  ;;  %1594 = vst [vmem:[#allocation9] sm:$0xff] %v1562_v23 }
 0x477   :  { %1595 = vst [vmem:[#allocation9 + $0x8] sm:$0xff] %v1563_v7  ;;  %v1572_v52 = vmul.f32 %v1501_v24, %v2514_v22  ;;  %v1573_v6 = vmul.f32 %v1505_v54, %v2517_v8  ;;  %v1574_v27 = vmul.f32 %v1509_v44, %v2507_v17  ;;  %v1575_v49 = vmul.f32 %v1513_v43, %v2510_v53 }
 0x478   :  { %1596 = vst [vmem:[#allocation9 + $0x10] sm:$0xff] %v1564_v0  ;;  %1597 = vst [vmem:[#allocation9 + $0x18] sm:$0xff] %v1565_v63  ;;  %v1576_v48 = vmul.f32 %v1509_v44, %v2528_v3  ;;  %v1577_v55 = vmul.f32 %v1513_v43, %v2531_v9  ;;  %v1578_v56 = vmul.f32 %v1517_v28, %v2521_v33 }
 0x479   :  { %1598 = vst [vmem:[#allocation9 + $0x20] sm:$0xff] %v1566_v50  ;;  %1599 = vst [vmem:[#allocation9 + $0x28] sm:$0xff] %v1567_v36  ;;  %v1579_v57 = vmul.f32 %v1521_v61, %v2525_v45  ;;  %v1580_v58 = vmul.f32 %v1517_v28, %v2543_v30  ;;  %v1581_v16 = vmul.f32 %v1521_v61, %v2547_v20 }
 0x47a   :  { %1600 = vst [vmem:[#allocation9 + $0x30] sm:$0xff] %v1568_v46  ;;  %1601 = vst [vmem:[#allocation9 + $0x38] sm:$0xff] %v1569_v62  ;;  %v1582_v17 = vmul.f32 %v1525_v40, %v2535_v18  ;;  %v1583_v53 = vmul.f32 %v1529_v38, %v2539_v31  ;;  %v1584_v22 = vmul.f32 %v1525_v40, %v2559_v39 }
 0x47b   :  { %1602 = vst [vmem:[#allocation9 + $0x40] sm:$0xff] %v1570_v41  ;;  %1603 = vst [vmem:[#allocation9 + $0x48] sm:$0xff] %v1571_v1  ;;  %v1585_v8 = vmul.f32 %v1529_v38, %v2563_v19  ;;  %v1586_v33 = vmul.f32 %v1533_v12, %v2551_v51  ;;  %v1587_v45 = vmul.f32 %v1537_v25, %v2555_v15 }
 0x47c   :  { %1604 = vst [vmem:[#allocation9 + $0x50] sm:$0xff] %v1572_v52  ;;  %1605 = vst [vmem:[#allocation9 + $0x58] sm:$0xff] %v1573_v6  ;;  %v1588_v3 = vmul.f32 %v1533_v12, %v2575_v35  ;;  %v1589_v9 = vmul.f32 %v1537_v25, %v2579_v34  ;;  %v1590_v18 = vmul.f32 %v1541_v60, %v2567_v29 }
 0x47d   :  { %1606 = vst [vmem:[#allocation9 + $0x60] sm:$0xff] %v1574_v27  ;;  %1607 = vst [vmem:[#allocation9 + $0x68] sm:$0xff] %v1575_v49  ;;  %v1591_v31 = vmul.f32 %v1545_v59, %v2571_v26  ;;  %v1592_v30 = vmul.f32 %v1541_v60, %v2583_v13  ;;  %v1593_v20 = vmul.f32 %v1545_v59, %v2587_v32 }
 0x47e   :  { %1608 = vst [vmem:[#allocation9 + $0x70] sm:$0xff] %v1576_v48  ;;  %1609 = vst [vmem:[#allocation9 + $0x78] sm:$0xff] %v1577_v55 }
 0x47f   :  { %1610 = vst [vmem:[#allocation9 + $0x80] sm:$0xff] %v1578_v56  ;;  %1611 = vst [vmem:[#allocation9 + $0x88] sm:$0xff] %v1579_v57 }
 0x480   :  { %1612 = vst [vmem:[#allocation9 + $0x90] sm:$0xff] %v1580_v58  ;;  %1613 = vst [vmem:[#allocation9 + $0x98] sm:$0xff] %v1581_v16 }
 0x481   :  { %1614 = vst [vmem:[#allocation9 + $0xa0] sm:$0xff] %v1582_v17  ;;  %1615 = vst [vmem:[#allocation9 + $0xa8] sm:$0xff] %v1583_v53 }
 0x482   :  { %1616 = vst [vmem:[#allocation9 + $0xb0] sm:$0xff] %v1584_v22  ;;  %1617 = vst [vmem:[#allocation9 + $0xb8] sm:$0xff] %v1585_v8 }
 0x483   :  { %1618 = vst [vmem:[#allocation9 + $0xc0] sm:$0xff] %v1586_v33  ;;  %1619 = vst [vmem:[#allocation9 + $0xc8] sm:$0xff] %v1587_v45 }
 0x484   :  { %1620 = vst [vmem:[#allocation9 + $0xd0] sm:$0xff] %v1588_v3  ;;  %1621 = vst [vmem:[#allocation9 + $0xd8] sm:$0xff] %v1589_v9 }
 0x485   :  { %1622 = vst [vmem:[#allocation9 + $0xe0] sm:$0xff] %v1590_v18  ;;  %1623 = vst [vmem:[#allocation9 + $0xe8] sm:$0xff] %v1591_v31 }
 0x486   :  { %1624 = vst [vmem:[#allocation9 + $0xf0] sm:$0xff] %v1592_v30  ;;  %1625 = vst [vmem:[#allocation9 + $0xf8] sm:$0xff] %v1593_v20 }
 0x487   :  { %1980 = shalt.err (!%p1977_p6)
}
 0x488   :  { %s1981_s27 = scalar_lea.hbm %s2657_s5, 4096 }
 0x489   :  { %p1982_p7 = scmp.ne.s32.totalorder %s2657_s5, %s1981_s27  ;;  %p1985_p8 = scmp.lt.u32.totalorder %s1981_s27, %s2657_s5 }
 0x48b   :  { %p1987_p9 = pnand %p1985_p8, %p1982_p7 }
 0x48d   :  { %1990 = shalt.err (!%p1987_p9)
}
 0x48e   :  { %1637 = dma.vmem_to_hbm [thread:$0]  %s1632_s23, 4096, %s2657_s5, [#allocation6], %s1998_s28, %s1998_s28, %s1999_s29  }
 0x48f   :  { %1995 = dma.done.wait [#allocation6], 4096  }
 0x490   :  { %1996 = vsyncadd [#allocation6], 4294963200 }
 0x491   :  { %1641 = vsyncpa [#allocation5], 1 }
 0x492   :  { %1642 = vsyncpa [#allocation8], 1 }
 0x493   :  { %1643 = vsyncpa [#allocation6], 1 }

</bundles_post_ra>
